<compile_context>
chip_gen: v7x
topology: tpu7x:2x2x1
jax: 0.10.0
libtpu: 0.0.40
codegen_flags: <defaults>
</compile_context>

<pallas_src>
import jax
import jax.numpy as jnp
import numpy as np
from jax.experimental import pallas as pl
from jax.experimental.pallas import tpu as pltpu

B = 8            # batch (>= 8 fills the MXU LHS sublane tile)
H = W = 16       # image spatial
CIN = 3          # image channels
K_PATCH = 3 * 3 * CIN      # 27
K_PAD = 32                 # lane-friendly padded K for the im2col matmul
VIS_FEAT = 512   # stand-in for resnet feature dim (2048 in module)
HID = 256        # 1024 in module
TXT_FEAT = 256   # 768 in module
EMB_DIM = 128    # opts.embDim
SEQ = 8          # text sequence length
VOCAB = 64       # vocab size (synthetic)
BN_EPS = 1e-5
NORM_EPS = 1e-12

# --- layout of the packed "misc" slab: one f32 (MISC_ROWS, VIS_FEAT) DMA ----
ROW_BC = 0           # conv-stem bias                    (1, VIS_FEAT)
ROW_BV = 1           # folded visual_embedding bias      (1, HID)
ROW_BR = 2           # folded recipe_embedding bias      (1, HID)
ROW_BA = 3           # shared align bias                 (1, EMB_DIM)
ROW_S2 = 4           # align_img / align_rec BN scale    (2, EMB_DIM)
ROW_SH2 = 6          # align_img / align_rec BN shift    (2, EMB_DIM)
ROW_PTXT = 8         # masked-mean pooling matrix        (B, B*SEQ)
MISC_ROWS = ROW_PTXT + B
MISC_W = VIS_FEAT


# ----------------------------------------------------------------------------
# Single fused kernel: per-image conv stem (im2col matmul) + ReLU + GAP with a
# running (B, VIS) accumulator, then (last grid step only) the recipe masked
# mean, per-branch folded-BN Linear+Tanh, shared align Linear on the stacked
# batch, folded-BN + Tanh + L2 norm.
# TODO(synk): the pretrained ResNet34 backbone (visionMLP) and pretrained
# mBERT word-embedding table have no clean Pallas equivalent without a
# checkpoint; replaced with a deterministic conv stem / random embedding.
# ----------------------------------------------------------------------------
def fused_kernel(patches_ref, wc_ref, whead_ref, wa_ref, tok_ref, misc_ref,
                 out_ref, vis_acc):
    f32 = jnp.float32
    b = pl.program_id(0)

    # ---- vision backbone stand-in: conv3x3 (im2col matmul) + ReLU + GAP ----
    act = jnp.dot(patches_ref[...], wc_ref[...], preferred_element_type=f32)
    act = jnp.maximum(act + misc_ref[ROW_BC:ROW_BC + 1, :VIS_FEAT], 0.0)
    # global-average-pool as a (1, HW) matmul -> rides the MXU, no sublane
    # reduction; one feature row per image / grid step.
    pool = jnp.full((1, H * W), 1.0 / (H * W), f32)
    vis_acc[pl.ds(b, 1), :] = jnp.dot(pool, act, preferred_element_type=f32)

    @pl.when(b == B - 1)
    def _epilogue():
        bf16 = jnp.bfloat16
        bv = misc_ref[ROW_BV:ROW_BV + 1, :HID]
        br = misc_ref[ROW_BR:ROW_BR + 1, :HID]
        ba = misc_ref[ROW_BA:ROW_BA + 1, :EMB_DIM]
        s2 = misc_ref[ROW_S2:ROW_S2 + 2, :EMB_DIM]
        sh2 = misc_ref[ROW_SH2:ROW_SH2 + 2, :EMB_DIM]
        pool_txt = misc_ref[ROW_PTXT:ROW_PTXT + B, :B * SEQ]

        # recipe branch: masked word-embedding mean as a matmul
        rec_feat = jnp.dot(pool_txt, tok_ref[...],
                           preferred_element_type=f32)            # (B, TXT)

        # per-branch (eval-BN folded) Linear + Tanh; weights share one slab
        hv = jnp.tanh(jnp.dot(vis_acc[...].astype(bf16),
                              whead_ref[:VIS_FEAT, :],
                              preferred_element_type=f32) + bv)    # (B, HID)
        hr = jnp.tanh(jnp.dot(rec_feat.astype(bf16),
                              whead_ref[VIS_FEAT:, :],
                              preferred_element_type=f32) + br)    # (B, HID)

        # stack branches in registers so the SHARED align matmul is issued once
        h = jnp.concatenate([hv, hr], axis=0)                      # (2B, HID)
        e = jnp.dot(h.astype(bf16), wa_ref[...],
                    preferred_element_type=f32) + ba               # (2B, EMB)

        # per-branch folded BN (scale/shift broadcast in-kernel) + Tanh
        s2b = jnp.concatenate([jnp.broadcast_to(s2[0:1], (B, EMB_DIM)),
                               jnp.broadcast_to(s2[1:2], (B, EMB_DIM))], 0)
        sh2b = jnp.concatenate([jnp.broadcast_to(sh2[0:1], (B, EMB_DIM)),
                                jnp.broadcast_to(sh2[1:2], (B, EMB_DIM))], 0)
        e = jnp.tanh(e * s2b + sh2b)

        # L2 norm over features; norm() clamps the norm at 1e-12
        ss = jnp.sum(e * e, axis=1, keepdims=True)
        out_ref[...] = e * jax.lax.rsqrt(jnp.maximum(ss, NORM_EPS * NORM_EPS))


def foodspace_fused(patches, wc, whead, wa, tok_flat, misc):
    def const2d(shape):
        return pl.BlockSpec(shape, lambda b: (0, 0))

    return pl.pallas_call(
        fused_kernel,
        grid=(B,),
        in_specs=[
            pl.BlockSpec((H * W, K_PAD), lambda b: (b, 0)),   # per-image patch tile
            const2d(wc.shape),       # conv stem weight (resident)
            const2d(whead.shape),    # folded [w_v; w_r] slab (resident)
            const2d(wa.shape),       # shared align weight (resident)
            const2d(tok_flat.shape), # word embeddings (resident)
            const2d(misc.shape),     # packed biases/scales/pooling (resident)
        ],
        out_specs=pl.BlockSpec((2 * B, EMB_DIM), lambda b: (0, 0)),
        out_shape=jax.ShapeDtypeStruct((2 * B, EMB_DIM), jnp.float32),
        scratch_shapes=[pltpu.VMEM((B, VIS_FEAT), jnp.float32)],
        compiler_params=pltpu.CompilerParams(
            # row axis is a reduction into vis_acc -> must stay "arbitrary"
            dimension_semantics=("arbitrary",),
            vmem_limit_bytes=32 * 1024 * 1024,
        ),
    )(patches, wc, whead, wa, tok_flat, misc)


# ----------------------------------------------------------------------------
# Glue: patch extraction (im2col), BN folding, parameter init, full forward.
# ----------------------------------------------------------------------------
def extract_patches(x_nchw):
    x = jnp.transpose(x_nchw, (0, 2, 3, 1))                # NCHW -> NHWC
    xp = jnp.pad(x, ((0, 0), (1, 1), (1, 1), (0, 0)))
    cols = []
    for dy in range(3):
        for dx in range(3):
            cols.append(xp[:, dy:dy + H, dx:dx + W, :])
    patches = jnp.concatenate(cols, axis=-1)               # (B, H, W, 27)
    patches = patches.reshape(B * H * W, K_PATCH)
    # zero-pad K 27 -> 32 so the matmul K axis is lane-aligned
    return jnp.pad(patches, ((0, 0), (0, K_PAD - K_PATCH)))


def bn_scale_shift(bn):
    g, be, m, v = bn
    scale = g * jax.lax.rsqrt(v + BN_EPS)                  # (1, F)
    shift = be - m * scale                                 # (1, F)
    return scale, shift


def fold_bn_linear(bn, w, b):
    """BN(x) @ w + b  ==  x @ w_f + b_f  with eval-mode BN folded into w."""
    scale, shift = bn_scale_shift(bn)
    w_f = w * scale[0][:, None]
    b_f = shift @ w + b
    return w_f, b_f


def init_params(key):
    ks = iter(jax.random.split(key, 32))

    def nrm(shape, std=0.05):
        return (std * jax.random.normal(next(ks), shape)).astype(jnp.float32)

    def bn(dim):
        gamma = 1.0 + nrm((1, dim), 0.1)
        beta = nrm((1, dim), 0.1)
        running_mean = nrm((1, dim), 0.1)
        running_var = (1.0 + 0.1 * jax.random.uniform(next(ks), (1, dim))
                       ).astype(jnp.float32)
        return (gamma, beta, running_mean, running_var)

    return {
        # vision conv stem (stand-in for resnet34)
        "wc": nrm((K_PATCH, VIS_FEAT)),
        "bc": nrm((1, VIS_FEAT)),
        # visual_embedding: BN(VIS_FEAT) + Linear(VIS_FEAT, HID) + Tanh
        "bn_v": bn(VIS_FEAT),
        "w_v": nrm((VIS_FEAT, HID)),
        "b_v": nrm((1, HID)),
        # recipe_embedding: BN(TXT_FEAT) + Linear(TXT_FEAT, HID) + Tanh
        "bn_r": bn(TXT_FEAT),
        "w_r": nrm((TXT_FEAT, HID)),
        "b_r": nrm((1, HID)),
        # align: Linear(HID, EMB_DIM) -- SHARED between branches
        "w_a": nrm((HID, EMB_DIM)),
        "b_a": nrm((1, EMB_DIM)),
        # align_img / align_rec: BN(EMB_DIM) + Tanh
        "bn_ai": bn(EMB_DIM),
        "bn_ar": bn(EMB_DIM),
        # word embedding table (stand-in for pretrained mBERT embeddings)
        "embed": nrm((VOCAB, TXT_FEAT), 0.5),
    }


@jax.jit
def foodspace_forward(params, x_img, y_tok):
    # ---- host-side prep (tiny; fused by XLA around the single pallas_call) --
    # bf16 weights/patches halve HBM->VMEM DMA; dots accumulate in f32.
    patches = extract_patches(x_img).astype(jnp.bfloat16)
    wc = jnp.pad(params["wc"],
                 ((0, K_PAD - K_PATCH), (0, 0))).astype(jnp.bfloat16)

    # word embedding gather + masked-mean pooling weights
    tok_emb = jnp.take(params["embed"], y_tok, axis=0)     # (B, L, D)
    tok_flat = tok_emb.reshape(B * SEQ, TXT_FEAT)
    mask = (y_tok > 0).astype(jnp.float32)                 # (B, L)
    cnt = jnp.maximum(jnp.sum(mask, axis=1, keepdims=True), 1.0)  # guard
    wmask = mask / cnt
    eye = jnp.eye(B, dtype=jnp.float32)
    pool_txt = (eye[:, :, None] * wmask[:, None, :]).reshape(B, B * SEQ)

    # fold eval-mode BatchNorms into the adjacent Linears (inference only)
    wv, bv = fold_bn_linear(params["bn_v"], params["w_v"], params["b_v"])
    wr, br = fold_bn_linear(params["bn_r"], params["w_r"], params["b_r"])
    whead = jnp.concatenate([wv, wr], axis=0).astype(jnp.bfloat16)  # (VIS+TXT, HID)
    wa = params["w_a"].astype(jnp.bfloat16)
    s2i, sh2i = bn_scale_shift(params["bn_ai"])
    s2r, sh2r = bn_scale_shift(params["bn_ar"])

    # pack all small per-feature operands into ONE lane-major slab (one DMA)
    def row(v):
        return jnp.pad(v, ((0, 0), (0, MISC_W - v.shape[1])))

    misc = jnp.concatenate([
        row(params["bc"]),
        row(bv),
        row(br),
        row(params["b_a"]),
        row(jnp.concatenate([s2i, s2r], axis=0)),
        row(jnp.concatenate([sh2i, sh2r], axis=0)),
        row(pool_txt),
    ], axis=0)                                             # (MISC_ROWS, 512)

    # ---- single fused Pallas kernel for both branches ----
    out = foodspace_fused(patches, wc, whead, wa, tok_flat, misc)
    # module returns [visual_emb, recipe_emb, w_score, attention];
    # w_score / attention are None in this configuration.
    return out[:B], out[B:]


# Pure-JAX f32 reference (original unfolded math, no Pallas) for sanity check.
def _head_ref(x, bn1, w1, b1, wa, ba, bn2):
    g1, be1, m1, v1 = bn1
    g2, be2, m2, v2 = bn2
    h = (x - m1) / jnp.sqrt(v1 + BN_EPS) * g1 + be1
    h = jnp.tanh(h @ w1 + b1)
    h = h @ wa + ba
    h = jnp.tanh((h - m2) / jnp.sqrt(v2 + BN_EPS) * g2 + be2)
    n = jnp.maximum(jnp.sqrt(jnp.sum(h * h, axis=1, keepdims=True)), NORM_EPS)
    return h / n


def forward_ref(params, x_img, y_tok):
    patches = extract_patches(x_img)[:, :K_PATCH]
    act = jnp.maximum(patches @ params["wc"] + params["bc"], 0.0)
    vis_feat = act.reshape(B, H * W, VIS_FEAT).mean(axis=1)
    v = _head_ref(vis_feat, params["bn_v"], params["w_v"], params["b_v"],
                  params["w_a"], params["b_a"], params["bn_ai"])
    tok_emb = jnp.take(params["embed"], y_tok, axis=0)
    mask = (y_tok > 0).astype(jnp.float32)
    cnt = jnp.maximum(mask.sum(1, keepdims=True), 1.0)
    feat = (tok_emb * mask[:, :, None]).sum(1) / cnt
    r = _head_ref(feat, params["bn_r"], params["w_r"], params["b_r"],
                  params["w_a"], params["b_a"], params["bn_ar"])
    return v, r


if __name__ == "__main__":
    key = jax.random.PRNGKey(0)
    k_params, k_img, k_tok = jax.random.split(key, 3)

    params = init_params(k_params)
    x_img = jax.random.normal(k_img, (B, CIN, H, W), dtype=jnp.float32)
    y_tok = jax.random.randint(k_tok, (B, SEQ), 0, VOCAB, dtype=jnp.int32)
    y_tok = y_tok.at[:, 0].set(1)   # guarantee at least one non-pad token/row

    visual_emb, recipe_emb = foodspace_forward(params, x_img, y_tok)
    jax.block_until_ready((visual_emb, recipe_emb))

    # reference is pure f32; kernel uses bf16 weights -> loosen the tolerance
    v_ref, r_ref = forward_ref(params, x_img, y_tok)
    np.testing.assert_allclose(np.asarray(visual_emb), np.asarray(v_ref),
                               rtol=2e-2, atol=2e-2)
    np.testing.assert_allclose(np.asarray(recipe_emb), np.asarray(r_ref),
                               rtol=2e-2, atol=2e-2)
    assert visual_emb.shape == (B, EMB_DIM) and recipe_emb.shape == (B, EMB_DIM)
    assert np.all(np.isfinite(np.asarray(visual_emb)))
    assert np.all(np.isfinite(np.asarray(recipe_emb)))

    print("KERNEL_OK")
</pallas_src>

<mosaic_0001>
module attributes {stable_mosaic.version = 11 : i64} {
  func.func @fused_kernel(%arg0: i32, %arg1: memref<256x32xbf16, #tpu.memory_space<vmem>>, %arg2: memref<32x512xbf16, #tpu.memory_space<vmem>>, %arg3: memref<768x256xbf16, #tpu.memory_space<vmem>>, %arg4: memref<256x128xbf16, #tpu.memory_space<vmem>>, %arg5: memref<64x256xf32, #tpu.memory_space<vmem>>, %arg6: memref<16x512xf32, #tpu.memory_space<vmem>>, %arg7: memref<16x128xf32, #tpu.memory_space<vmem>>, %arg8: memref<8x512xf32, #tpu.memory_space<vmem>>) attributes {dimension_semantics = [#tpu.dimension_semantics<arbitrary>], iteration_bounds = array<i64: 8>, scalar_prefetch = 0 : i64, scratch_operands = 1 : i64, tpu.core_type = #tpu.core_type<tc>, window_params = [{transform_indices = @transform_0, window_bounds = array<i64: 256, 32>}, {pipeline_mode = #tpu.pipeline_mode<synchronous>, transform_indices = @transform_1, window_bounds = array<i64: 32, 512>}, {pipeline_mode = #tpu.pipeline_mode<synchronous>, transform_indices = @transform_2, window_bounds = array<i64: 768, 256>}, {pipeline_mode = #tpu.pipeline_mode<synchronous>, transform_indices = @transform_3, window_bounds = array<i64: 256, 128>}, {pipeline_mode = #tpu.pipeline_mode<synchronous>, transform_indices = @transform_4, window_bounds = array<i64: 64, 256>}, {pipeline_mode = #tpu.pipeline_mode<synchronous>, transform_indices = @transform_5, window_bounds = array<i64: 16, 512>}, {pipeline_mode = #tpu.pipeline_mode<synchronous>, transform_indices = @transform_6, window_bounds = array<i64: 16, 128>}]} {
    %c0 = arith.constant 0 : index
    %c0_0 = arith.constant 0 : index
    %0 = vector.load %arg1[%c0, %c0_0] : memref<256x32xbf16, #tpu.memory_space<vmem>>, vector<256x32xbf16>
    %c0_1 = arith.constant 0 : index
    %c0_2 = arith.constant 0 : index
    %1 = vector.load %arg2[%c0_1, %c0_2] : memref<32x512xbf16, #tpu.memory_space<vmem>>, vector<32x512xbf16>
    %cst = arith.constant dense<0.000000e+00> : vector<256x512xf32>
    %2 = tpu.matmul %0, %1, %cst {dimension_numbers = #tpu.dot_dimension_numbers<[1], [0], [0], [1], [0, 0, 1, 1], [], []>} : vector<256x32xbf16>, vector<32x512xbf16>, vector<256x512xf32> -> vector<256x512xf32>
    %c0_3 = arith.constant 0 : index
    %c0_4 = arith.constant 0 : index
    %3 = vector.load %arg6[%c0_3, %c0_4] : memref<16x512xf32, #tpu.memory_space<vmem>>, vector<1x512xf32>
    %4 = vector.broadcast %3 : vector<1x512xf32> to vector<256x512xf32>
    %5 = arith.addf %2, %4 : vector<256x512xf32>
    %cst_5 = arith.constant 0.000000e+00 : f32
    %6 = vector.broadcast %cst_5 : f32 to vector<256x512xf32>
    %7 = arith.maximumf %5, %6 : vector<256x512xf32>
    %cst_6 = arith.constant 3.906250e-03 : f32
    %8 = vector.broadcast %cst_6 : f32 to vector<1x256xf32>
    %cst_7 = arith.constant dense<0.000000e+00> : vector<1x512xf32>
    %9 = tpu.matmul %8, %7, %cst_7 {dimension_numbers = #tpu.dot_dimension_numbers<[1], [0], [0], [1], [0, 0, 1, 1], [], []>} : vector<1x256xf32>, vector<256x512xf32>, vector<1x512xf32> -> vector<1x512xf32>
    %10 = arith.index_cast %arg0 : i32 to index
    %c0_8 = arith.constant 0 : index
    %11 = vector.load %arg8[%10, %c0_8] : memref<8x512xf32, #tpu.memory_space<vmem>>, vector<1x512xf32>
    tpu.vector_store %arg8[%10, %c0_8], %9 {strides = array<i32>} : memref<8x512xf32, #tpu.memory_space<vmem>>, vector<1x512xf32>,
    %c7_i32 = arith.constant 7 : i32
    %12 = arith.cmpi eq, %arg0, %c7_i32 : i32
    %13 = arith.extui %12 : i1 to i32
    %c0_i32 = arith.constant 0 : i32
    %14 = arith.cmpi ne, %13, %c0_i32 : i32
    scf.if %14 {
      %c1 = arith.constant 1 : index
      %c0_9 = arith.constant 0 : index
      %15 = vector.load %arg6[%c1, %c0_9] : memref<16x512xf32, #tpu.memory_space<vmem>>, vector<1x256xf32>
      %c2 = arith.constant 2 : index
      %c0_10 = arith.constant 0 : index
      %16 = vector.load %arg6[%c2, %c0_10] : memref<16x512xf32, #tpu.memory_space<vmem>>, vector<1x256xf32>
      %c3 = arith.constant 3 : index
      %c0_11 = arith.constant 0 : index
      %17 = vector.load %arg6[%c3, %c0_11] : memref<16x512xf32, #tpu.memory_space<vmem>>, vector<1x128xf32>
      %c4 = arith.constant 4 : index
      %c0_12 = arith.constant 0 : index
      %18 = vector.load %arg6[%c4, %c0_12] : memref<16x512xf32, #tpu.memory_space<vmem>>, vector<2x128xf32>
      %c6 = arith.constant 6 : index
      %c0_13 = arith.constant 0 : index
      %19 = vector.load %arg6[%c6, %c0_13] : memref<16x512xf32, #tpu.memory_space<vmem>>, vector<2x128xf32>
      %c8 = arith.constant 8 : index
      %c0_14 = arith.constant 0 : index
      %20 = vector.load %arg6[%c8, %c0_14] : memref<16x512xf32, #tpu.memory_space<vmem>>, vector<8x64xf32>
      %c0_15 = arith.constant 0 : index
      %c0_16 = arith.constant 0 : index
      %21 = vector.load %arg5[%c0_15, %c0_16] : memref<64x256xf32, #tpu.memory_space<vmem>>, vector<64x256xf32>
      %cst_17 = arith.constant dense<0.000000e+00> : vector<8x256xf32>
      %22 = tpu.matmul %20, %21, %cst_17 {dimension_numbers = #tpu.dot_dimension_numbers<[1], [0], [0], [1], [0, 0, 1, 1], [], []>} : vector<8x64xf32>, vector<64x256xf32>, vector<8x256xf32> -> vector<8x256xf32>
      %c0_18 = arith.constant 0 : index
      %c0_19 = arith.constant 0 : index
      %23 = vector.load %arg8[%c0_18, %c0_19] : memref<8x512xf32, #tpu.memory_space<vmem>>, vector<8x512xf32>
      %24 = arith.truncf %23 : vector<8x512xf32> to vector<8x512xbf16>
      %c0_20 = arith.constant 0 : index
      %c0_21 = arith.constant 0 : index
      %25 = vector.load %arg3[%c0_20, %c0_21] : memref<768x256xbf16, #tpu.memory_space<vmem>>, vector<512x256xbf16>
      %cst_22 = arith.constant dense<0.000000e+00> : vector<8x256xf32>
      %26 = tpu.matmul %24, %25, %cst_22 {dimension_numbers = #tpu.dot_dimension_numbers<[1], [0], [0], [1], [0, 0, 1, 1], [], []>} : vector<8x512xbf16>, vector<512x256xbf16>, vector<8x256xf32> -> vector<8x256xf32>
      %27 = vector.broadcast %15 : vector<1x256xf32> to vector<8x256xf32>
      %28 = arith.addf %26, %27 : vector<8x256xf32>
      %29 = math.tanh %28 : vector<8x256xf32>
      %30 = arith.truncf %22 : vector<8x256xf32> to vector<8x256xbf16>
      %c512 = arith.constant 512 : index
      %c0_23 = arith.constant 0 : index
      %31 = vector.load %arg3[%c512, %c0_23] : memref<768x256xbf16, #tpu.memory_space<vmem>>, vector<256x256xbf16>
      %cst_24 = arith.constant dense<0.000000e+00> : vector<8x256xf32>
      %32 = tpu.matmul %30, %31, %cst_24 {dimension_numbers = #tpu.dot_dimension_numbers<[1], [0], [0], [1], [0, 0, 1, 1], [], []>} : vector<8x256xbf16>, vector<256x256xbf16>, vector<8x256xf32> -> vector<8x256xf32>
      %33 = vector.broadcast %16 : vector<1x256xf32> to vector<8x256xf32>
      %34 = arith.addf %32, %33 : vector<8x256xf32>
      %35 = math.tanh %34 : vector<8x256xf32>
      %36 = tpu.concatenate %29, %35 in 0 : vector<8x256xf32>, vector<8x256xf32> -> vector<16x256xf32>
      %37 = arith.truncf %36 : vector<16x256xf32> to vector<16x256xbf16>
      %c0_25 = arith.constant 0 : index
      %c0_26 = arith.constant 0 : index
      %38 = vector.load %arg4[%c0_25, %c0_26] : memref<256x128xbf16, #tpu.memory_space<vmem>>, vector<256x128xbf16>
      %cst_27 = arith.constant dense<0.000000e+00> : vector<16x128xf32>
      %39 = tpu.matmul %37, %38, %cst_27 {dimension_numbers = #tpu.dot_dimension_numbers<[1], [0], [0], [1], [0, 0, 1, 1], [], []>} : vector<16x256xbf16>, vector<256x128xbf16>, vector<16x128xf32> -> vector<16x128xf32>
      %40 = vector.broadcast %17 : vector<1x128xf32> to vector<16x128xf32>
      %41 = arith.addf %39, %40 : vector<16x128xf32>
      %42 = vector.extract_strided_slice %18 {offsets = [0, 0], sizes = [1, 128], strides = [1, 1]} : vector<2x128xf32> to vector<1x128xf32>
      %43 = vector.shape_cast %42 : vector<1x128xf32> to vector<1x128xf32>
      %44 = vector.broadcast %43 : vector<1x128xf32> to vector<8x128xf32>
      %45 = vector.extract_strided_slice %18 {offsets = [1, 0], sizes = [1, 128], strides = [1, 1]} : vector<2x128xf32> to vector<1x128xf32>
      %46 = vector.shape_cast %45 : vector<1x128xf32> to vector<1x128xf32>
      %47 = vector.broadcast %46 : vector<1x128xf32> to vector<8x128xf32>
      %48 = tpu.concatenate %44, %47 in 0 : vector<8x128xf32>, vector<8x128xf32> -> vector<16x128xf32>
      %49 = vector.extract_strided_slice %19 {offsets = [0, 0], sizes = [1, 128], strides = [1, 1]} : vector<2x128xf32> to vector<1x128xf32>
      %50 = vector.shape_cast %49 : vector<1x128xf32> to vector<1x128xf32>
      %51 = vector.broadcast %50 : vector<1x128xf32> to vector<8x128xf32>
      %52 = vector.extract_strided_slice %19 {offsets = [1, 0], sizes = [1, 128], strides = [1, 1]} : vector<2x128xf32> to vector<1x128xf32>
      %53 = vector.shape_cast %52 : vector<1x128xf32> to vector<1x128xf32>
      %54 = vector.broadcast %53 : vector<1x128xf32> to vector<8x128xf32>
      %55 = tpu.concatenate %51, %54 in 0 : vector<8x128xf32>, vector<8x128xf32> -> vector<16x128xf32>
      %56 = arith.mulf %41, %48 : vector<16x128xf32>
      %57 = arith.addf %56, %55 : vector<16x128xf32>
      %58 = math.tanh %57 : vector<16x128xf32>
      %59 = arith.mulf %58, %58 : vector<16x128xf32>
      %cst_28 = arith.constant dense<0.000000e+00> : vector<16xf32>
      %60 = vector.multi_reduction <add>, %59, %cst_28 [1] : vector<16x128xf32> to vector<16xf32>
      %61 = vector.shape_cast %60 : vector<16xf32> to vector<16x1xf32>
      %cst_29 = arith.constant 1.000000e-24 : f32
      %62 = vector.broadcast %cst_29 : f32 to vector<16x1xf32>
      %63 = arith.maximumf %61, %62 : vector<16x1xf32>
      %64 = math.rsqrt %63 : vector<16x1xf32>
      %65 = vector.broadcast %64 : vector<16x1xf32> to vector<16x128xf32>
      %66 = arith.mulf %58, %65 : vector<16x128xf32>
      %c0_30 = arith.constant 0 : index
      %c0_31 = arith.constant 0 : index
      %67 = vector.load %arg7[%c0_30, %c0_31] : memref<16x128xf32, #tpu.memory_space<vmem>>, vector<16x128xf32>
      tpu.vector_store %arg7[%c0_30, %c0_31], %66 {strides = array<i32>} : memref<16x128xf32, #tpu.memory_space<vmem>>, vector<16x128xf32>,
    } else {
    }
    return
  }
  func.func @transform_0(%arg0: i32) -> (i32, i32) {
    %c0_i32 = arith.constant 0 : i32
    %c0_i32_0 = arith.constant 0 : i32
    return %arg0, %c0_i32 : i32, i32
  }
  func.func @transform_1(%arg0: i32) -> (i32, i32) {
    %c0_i32 = arith.constant 0 : i32
    %c0_i32_0 = arith.constant 0 : i32
    %c0_i32_1 = arith.constant 0 : i32
    return %c0_i32, %c0_i32_0 : i32, i32
  }
  func.func @transform_2(%arg0: i32) -> (i32, i32) {
    %c0_i32 = arith.constant 0 : i32
    %c0_i32_0 = arith.constant 0 : i32
    %c0_i32_1 = arith.constant 0 : i32
    return %c0_i32, %c0_i32_0 : i32, i32
  }
  func.func @transform_3(%arg0: i32) -> (i32, i32) {
    %c0_i32 = arith.constant 0 : i32
    %c0_i32_0 = arith.constant 0 : i32
    %c0_i32_1 = arith.constant 0 : i32
    return %c0_i32, %c0_i32_0 : i32, i32
  }
  func.func @transform_4(%arg0: i32) -> (i32, i32) {
    %c0_i32 = arith.constant 0 : i32
    %c0_i32_0 = arith.constant 0 : i32
    %c0_i32_1 = arith.constant 0 : i32
    return %c0_i32, %c0_i32_0 : i32, i32
  }
  func.func @transform_5(%arg0: i32) -> (i32, i32) {
    %c0_i32 = arith.constant 0 : i32
    %c0_i32_0 = arith.constant 0 : i32
    %c0_i32_1 = arith.constant 0 : i32
    return %c0_i32, %c0_i32_0 : i32, i32
  }
  func.func @transform_6(%arg0: i32) -> (i32, i32) {
    %c0_i32 = arith.constant 0 : i32
    %c0_i32_0 = arith.constant 0 : i32
    %c0_i32_1 = arith.constant 0 : i32
    return %c0_i32, %c0_i32_0 : i32, i32
  }
}

</mosaic_0001>

<bundles_post_ra>
// kernel: foodspace_forward.1
= control target key start
LH: loop header
LB: loop body
LE: loop exit
PB: predicated region body
PF: predicated region fallthrough
CT: control target
= control target key end

     0   :  { %s2864_s21 = smov 0   ;;  %s3564_s0 = inlined_call_operand.vmem [shape: bf16[2048,32], index: 0, kind: input, shape index: {}]   ;;  %s3565_s1 = inlined_call_operand.vmem [shape: bf16[32,512], index: 1, kind: input, shape index: {}]   ;;  %s3566_s2 = inlined_call_operand.vmem [shape: bf16[768,256], index: 2, kind: input, shape index: {}]   ;;  %s3567_s3 = inlined_call_operand.vmem [shape: bf16[256,128], index: 3, kind: input, shape index: {}]   ;;  %s3568_s4 = inlined_call_operand.vmem [shape: f32[64,256], index: 4, kind: input, shape index: {}]   ;;  %s3569_s5 = inlined_call_operand.vmem [shape: f32[16,512], index: 5, kind: input, shape index: {}]   ;;  %s3570_s6 = inlined_call_operand.vmem [shape: f32[16,128], index: 6, kind: output, shape index: {}]  }
   0x1 LB: > { %s2870_s22 = sadd.s32 4294967295, %s2823_s21   ;;  %p2249_p0 = scmp.ge.s32.totalorder %s2823_s21, 1  ;;  %s2823_s21 = sphi %s2864_s21, %s16_s21  }
   0x2   : > { %p208_p1 = scmp.lt.s32.totalorder %s2823_s21, 9 }
   0x4   : > { %p209_p2 = pnand %p2249_p0, %p208_p1 }
   0x5   : > { %v2613_v0 = vld [vmem:[%s3565_s1 + $0x4] ss:$16 sps:$4 sm:$0xff] (!%p209_p2)   ;;  %s2250_s25 = sshll.u32 (!%p209_p2), %s2870_s22, 5  ;;  %v2615_v1 = vld [vmem:[%s3565_s1 + $0xc] ss:$16 sps:$4 sm:$0xff] (!%p209_p2)   ;;  %v2825_v2 = vmov (!%p209_p2), 0   ;;  %v282_v25 = vlaneseq (!%p209_p2) }
   0x6   : > { %212 = sbr.rel (%p209_p2) target bundleno = 1289 (0x509), region = 44  ;;  %503 = vmatprep.mubr.bf16.mxu0 (!%p209_p2), %v2825_v2  ;;  %696 = vmatprep.mubr.bf16.mxu1 (!%p209_p2), %v2825_v2  ;;  %p234_p3 = scmp.lt.s32.totalorder (!%p209_p2), %s2250_s25, 255  ;;  %v2617_v3 = vld [vmem:[%s3565_s1] ss:$16 sps:$4 sm:$0xff] (!%p209_p2)   ;;  %v2618_v4 = vld [vmem:[%s3565_s1 + $0x8] ss:$16 sps:$4 sm:$0xff] (!%p209_p2)  }
   0x7   : > { %471 = vmatprep.subr.bf16.mxu0 (!%p209_p2), %v2613_v0  ;;  %664 = vmatprep.subr.bf16.mxu1 (!%p209_p2), %v2615_v1  ;;  %v2619_v5 = vld [vmem:[%s3565_s1 + $0x24] ss:$16 sps:$4 sm:$0xff] (!%p209_p2)   ;;  %v2621_v6 = vld [vmem:[%s3565_s1 + $0x2c] ss:$16 sps:$4 sm:$0xff] (!%p209_p2)   ;;  %v2623_v7 = vld [vmem:[%s3565_s1 + $0x20] ss:$16 sps:$4 sm:$0xff] (!%p209_p2)  }
   0x8   : > { %472 = vmatpush1.bf16.msra.mxu0 (!%p209_p2), %v2617_v3  ;;  %665 = vmatpush1.bf16.msra.mxu1 (!%p209_p2), %v2618_v4  ;;  %v2624_v8 = vld [vmem:[%s3565_s1 + $0x28] ss:$16 sps:$4 sm:$0xff] (!%p209_p2)   ;;  %vm422_vm0 = vcmask (!%p209_p2), 261120   ;;  %v2985_v26 = vshrl.u32 (!%p209_p2), %v282_v25, 7  ;;  %v2826_v60 = vmov (!%p209_p2), 0.00390625   ;;  %s1160_s24 = sshra.s32 (!%p209_p2), %s2870_s22, 3 }
   0x9   : > { %473 = vmatprep.subr.bf16.mxu0 (!%p209_p2), %v2619_v5  ;;  %666 = vmatprep.subr.bf16.mxu1 (!%p209_p2), %v2621_v6  ;;  %v280_v29 = vld [vmem:[%s3569_s5] ss:$8 sm:$0xf] (!%p209_p2)  ;;  %s2428_s26 = sshll.u32 (!%p209_p2), %s1160_s24, 5  ;;  %vm1158_vm1 = vcmp.lt.s32.totalorder (!%p209_p2), %v282_v25, 512  ;;  %p2310_p4 = scmp.ne.s32.totalorder (!%p209_p2), %s2870_s22, 7 }
   0xa   : > { %v2988_v27 = vsub.s32 (!%p209_p2), 0, %v2985_v26  ;;  %v292_v28 = vsub.s32 (!%p209_p2), 2, %v2985_v26  ;;  %v2995_v30 = vsub.s32 (!%p209_p2), 1, %v2985_v26  ;;  %v296_v31 = vsub.s32 (!%p209_p2), 3, %v2985_v26 }
   0xc   : > { %474 = vmatpush1.bf16.msra.mxu0 (!%p209_p2), %v2623_v7  ;;  %667 = vmatpush1.bf16.msra.mxu1 (!%p209_p2), %v2624_v8  ;;  %v2999_v32 = vrot.slane (!%p209_p2), %v280_v29, %v2988_v27  ;;  %v3001_v33 = vrot.slane (!%p209_p2), %v280_v29, %v292_v28  ;;  %v3004_v34 = vrot.slane (!%p209_p2), %v280_v29, %v2995_v30 }
   0xd   : > { %s3572_s25 = smov (!%p234_p3, %s2250_s25), 255  ;;  %v3006_v35 = vrot.slane %v280_v29, %v296_v31  ;;  %v1184_v25 = vld [vmem:[%s3568_s4 + $0x10] sm:$0xff] (!%p2310_p4)  ;;  %vm1198_vm2 = vcmask (!%p2310_p4), 523264  }
   0xe   : > { %s2251_s16 = sshll.u32 %s3572_s25, 2  ;;  %s1163_s25 = sand.u32 7, %s2870_s22 }
   0xf   : > { %s2904_s19 = scalar_lea.vmem %s3564_s0, %s2251_s16  ;;  %s1166_s27 = sadd.s32 %s2428_s26, %s1163_s25 }
  0x10   : > { %v2625_v9 = vld [vmem:[%s2904_s19] sm:$0xff]   ;;  %v2626_v10 = vld [vmem:[%s2904_s19 + $0x8] sm:$0xff]   ;;  %v2627_v11 = vld [vmem:[%s2904_s19 + $0x10] sm:$0xff]   ;;  %s1167_s28 = scalar_lea.vmem [#allocation2], %s1166_s27 }
  0x11   : > { %2276 = vmatmul.mubr.msk.bf16.vlgmr.msra.gmra.mrb[0].mxu0 %vm422_vm0, %v2625_v9  ;;  %2292 = vmatmul.mubr.msk.bf16.vlgmr.msra.gmra.mrb[0].mxu1 %vm422_vm0, %v2625_v9  ;;  %v2628_v12 = vld [vmem:[%s2904_s19 + $0x18] sm:$0xff]   ;;  %v2629_v13 = vld [vmem:[%s2904_s19 + $0x20] sm:$0xff]   ;;  %v2630_v14 = vld [vmem:[%s2904_s19 + $0x28] sm:$0xff]  }
  0x12   : > { %513 = vmatprep.mubr.bf16.mxu0 %v2825_v2  ;;  %706 = vmatprep.mubr.bf16.mxu1 %v2825_v2  ;;  %v2631_v15 = vld [vmem:[%s2904_s19 + $0x30] sm:$0xff]   ;;  %v2632_v16 = vld [vmem:[%s2904_s19 + $0x38] sm:$0xff]   ;;  %v2633_v17 = vld [vmem:[%s2904_s19 + $0x40] sm:$0xff]  }
  0x13   : > { %v2634_v18 = vld [vmem:[%s2904_s19 + $0x48] sm:$0xff]   ;;  %v2635_v19 = vld [vmem:[%s2904_s19 + $0x50] sm:$0xff]   ;;  %v2636_v20 = vld [vmem:[%s2904_s19 + $0x58] sm:$0xff]  }
  0x14   : > { %v2637_v21 = vld [vmem:[%s2904_s19 + $0x60] sm:$0xff]   ;;  %v2638_v22 = vld [vmem:[%s2904_s19 + $0x68] sm:$0xff]   ;;  %v2639_v23 = vld [vmem:[%s2904_s19 + $0x70] sm:$0xff]  }
  0x15   : > { %v2640_v24 = vld [vmem:[%s2904_s19 + $0x78] sm:$0xff]  }
  0x19   : > { %2277 = vmatmul.mubr.msk.bf16.gmra.mrb[4].mxu0 %vm422_vm0, %v2626_v10  ;;  %2293 = vmatmul.mubr.msk.bf16.gmra.mrb[4].mxu1 %vm422_vm0, %v2626_v10 }
  0x1a   : > { %523 = vmatprep.mubr.bf16.mxu0 %v2825_v2  ;;  %716 = vmatprep.mubr.bf16.mxu1 %v2825_v2 }
  0x21   : > { %2278 = vmatmul.mubr.msk.bf16.gmra.mrb[8].mxu0 %vm422_vm0, %v2627_v11  ;;  %2294 = vmatmul.mubr.msk.bf16.gmra.mrb[8].mxu1 %vm422_vm0, %v2627_v11 }
  0x22   : > { %533 = vmatprep.mubr.bf16.mxu0 %v2825_v2  ;;  %726 = vmatprep.mubr.bf16.mxu1 %v2825_v2 }
  0x29   : > { %2279 = vmatmul.mubr.msk.bf16.gmra.mrb[12].mxu0 %vm422_vm0, %v2628_v12  ;;  %2295 = vmatmul.mubr.msk.bf16.gmra.mrb[12].mxu1 %vm422_vm0, %v2628_v12 }
  0x2a   : > { %543 = vmatprep.mubr.bf16.mxu0 %v2825_v2  ;;  %736 = vmatprep.mubr.bf16.mxu1 %v2825_v2 }
  0x31   : > { %2280 = vmatmul.mubr.msk.bf16.gmra.mrb[16].mxu0 %vm422_vm0, %v2629_v13  ;;  %2296 = vmatmul.mubr.msk.bf16.gmra.mrb[16].mxu1 %vm422_vm0, %v2629_v13 }
  0x32   : > { %553 = vmatprep.mubr.bf16.mxu0 %v2825_v2  ;;  %746 = vmatprep.mubr.bf16.mxu1 %v2825_v2 }
  0x39   : > { %2281 = vmatmul.mubr.msk.bf16.gmra.mrb[20].mxu0 %vm422_vm0, %v2630_v14  ;;  %2297 = vmatmul.mubr.msk.bf16.gmra.mrb[20].mxu1 %vm422_vm0, %v2630_v14 }
  0x3a   : > { %563 = vmatprep.mubr.bf16.mxu0 %v2825_v2  ;;  %756 = vmatprep.mubr.bf16.mxu1 %v2825_v2 }
  0x41   : > { %2282 = vmatmul.mubr.msk.bf16.gmra.mrb[24].mxu0 %vm422_vm0, %v2631_v15  ;;  %2298 = vmatmul.mubr.msk.bf16.gmra.mrb[24].mxu1 %vm422_vm0, %v2631_v15 }
  0x42   : > { %573 = vmatprep.mubr.bf16.mxu0 %v2825_v2  ;;  %766 = vmatprep.mubr.bf16.mxu1 %v2825_v2 }
  0x49   : > { %2283 = vmatmul.mubr.msk.bf16.gmra.mrb[28].mxu0 %vm422_vm0, %v2632_v16  ;;  %2299 = vmatmul.mubr.msk.bf16.gmra.mrb[28].mxu1 %vm422_vm0, %v2632_v16 }
  0x4a   : > { %583 = vmatprep.mubr.bf16.mxu0 %v2825_v2  ;;  %776 = vmatprep.mubr.bf16.mxu1 %v2825_v2 }
  0x51   : > { %2284 = vmatmul.mubr.msk.bf16.gmra.mrb[32].mxu0 %vm422_vm0, %v2633_v17  ;;  %2300 = vmatmul.mubr.msk.bf16.gmra.mrb[32].mxu1 %vm422_vm0, %v2633_v17 }
  0x52   : > { %593 = vmatprep.mubr.bf16.mxu0 %v2825_v2  ;;  %786 = vmatprep.mubr.bf16.mxu1 %v2825_v2 }
  0x59   : > { %2285 = vmatmul.mubr.msk.bf16.gmra.mrb[36].mxu0 %vm422_vm0, %v2634_v18  ;;  %2301 = vmatmul.mubr.msk.bf16.gmra.mrb[36].mxu1 %vm422_vm0, %v2634_v18 }
  0x5a   : > { %603 = vmatprep.mubr.bf16.mxu0 %v2825_v2  ;;  %796 = vmatprep.mubr.bf16.mxu1 %v2825_v2 }
  0x61   : > { %2286 = vmatmul.mubr.msk.bf16.gmra.mrb[40].mxu0 %vm422_vm0, %v2635_v19  ;;  %2302 = vmatmul.mubr.msk.bf16.gmra.mrb[40].mxu1 %vm422_vm0, %v2635_v19 }
  0x62   : > { %613 = vmatprep.mubr.bf16.mxu0 %v2825_v2  ;;  %806 = vmatprep.mubr.bf16.mxu1 %v2825_v2 }
  0x69   : > { %2287 = vmatmul.mubr.msk.bf16.gmra.mrb[44].mxu0 %vm422_vm0, %v2636_v20  ;;  %2303 = vmatmul.mubr.msk.bf16.gmra.mrb[44].mxu1 %vm422_vm0, %v2636_v20 }
  0x6a   : > { %623 = vmatprep.mubr.bf16.mxu0 %v2825_v2  ;;  %816 = vmatprep.mubr.bf16.mxu1 %v2825_v2 }
  0x71   : > { %2288 = vmatmul.mubr.msk.bf16.gmra.mrb[48].mxu0 %vm422_vm0, %v2637_v21  ;;  %2304 = vmatmul.mubr.msk.bf16.gmra.mrb[48].mxu1 %vm422_vm0, %v2637_v21 }
  0x72   : > { %633 = vmatprep.mubr.bf16.mxu0 %v2825_v2  ;;  %826 = vmatprep.mubr.bf16.mxu1 %v2825_v2 }
  0x79   : > { %2289 = vmatmul.mubr.msk.bf16.gmra.mrb[52].mxu0 %vm422_vm0, %v2638_v22  ;;  %2305 = vmatmul.mubr.msk.bf16.gmra.mrb[52].mxu1 %vm422_vm0, %v2638_v22 }
  0x7a   : > { %643 = vmatprep.mubr.bf16.mxu0 %v2825_v2  ;;  %836 = vmatprep.mubr.bf16.mxu1 %v2825_v2 }
  0x81   : > { %2290 = vmatmul.mubr.msk.bf16.gmra.mrb[56].mxu0 %vm422_vm0, %v2639_v23  ;;  %2306 = vmatmul.mubr.msk.bf16.gmra.mrb[56].mxu1 %vm422_vm0, %v2639_v23 }
  0x82   : > { %653 = vmatprep.mubr.bf16.mxu0 %v2825_v2  ;;  %846 = vmatprep.mubr.bf16.mxu1 %v2825_v2 }
  0x89   : > { %2291 = vmatmul.mubr.msk.bf16.gmra.mrb[60].mxu0 %vm422_vm0, %v2640_v24  ;;  %2307 = vmatmul.mubr.msk.bf16.gmra.mrb[60].mxu1 %vm422_vm0, %v2640_v24 }
  0x8a   : > { %1049 = vmatprep.mubr.f32.mxu0 %v2826_v60  ;;  %1120 = vmatprep.mubr.f32.mxu1 %v2826_v60 }
  0xe4   : > { %v505_v36 = vpop.f32.mrb[0].mxu0  ;;  %v698_v37 = vpop.f32.mrb[0].mxu1 }
  0xe5   : > { %v506_v38 = vadd.f32 %v505_v36, %v2999_v32  ;;  %v699_v39 = vadd.f32 %v698_v37, %v3001_v33  ;;  %v507_v40 = vpop.f32.mrb[1].mxu0  ;;  %v700_v41 = vpop.f32.mrb[1].mxu1 }
  0xe6   : > { %v508_v42 = vadd.f32 %v507_v40, %v3004_v34  ;;  %v701_v43 = vadd.f32 %v700_v41, %v3006_v35  ;;  %v509_v44 = vpop.f32.mrb[2].mxu0  ;;  %v702_v45 = vpop.f32.mrb[2].mxu1 }
  0xe7   : > { %v510_v46 = vadd.f32 %v509_v44, %v2999_v32  ;;  %v703_v47 = vadd.f32 %v702_v45, %v3001_v33  ;;  %v511_v48 = vpop.f32.mrb[3].mxu0  ;;  %v704_v49 = vpop.f32.mrb[3].mxu1  ;;  %v857_v50 = vmax.f32 %v506_v38, 0.0  ;;  %v859_v53 = vmax.f32 %v699_v39, 0.0 }
  0xe8   : > { %v512_v51 = vadd.f32 %v511_v48, %v3004_v34  ;;  %v705_v52 = vadd.f32 %v704_v49, %v3006_v35  ;;  %v858_v56 = vmax.f32 %v508_v42, 0.0  ;;  %v860_v57 = vmax.f32 %v701_v43, 0.0 }
  0xe9   : > { %v861_v54 = vmax.f32 %v510_v46, 0.0  ;;  %v863_v55 = vmax.f32 %v703_v47, 0.0 }
  0xea   : > { %v862_v58 = vmax.f32 %v512_v51, 0.0  ;;  %v864_v59 = vmax.f32 %v705_v52, 0.0 }
  0xeb   : > { %v2453_v61 = vpack.c.bf16 %v861_v54, %v857_v50  ;;  %v2517_v62 = vpack.c.bf16 %v863_v55, %v859_v53 }
  0xec   : > { %v2451_v63 = vpack.c.bf16 %v862_v58, %v858_v56  ;;  %v2515_v0 = vpack.c.bf16 %v864_v59, %v860_v57  ;;  %v515_v1 = vpop.f32.mrb[4].mxu0  ;;  %v708_v2 = vpop.f32.mrb[4].mxu1 }
  0xed   : > { %v516_v3 = vadd.f32 %v515_v1, %v2999_v32  ;;  %v709_v4 = vadd.f32 %v708_v2, %v3001_v33  ;;  %v517_v5 = vpop.f32.mrb[5].mxu0  ;;  %v710_v6 = vpop.f32.mrb[5].mxu1 }
  0xee   : > { %v518_v7 = vadd.f32 %v517_v5, %v3004_v34  ;;  %v711_v8 = vadd.f32 %v710_v6, %v3006_v35  ;;  %v519_v9 = vpop.f32.mrb[6].mxu0  ;;  %v712_v10 = vpop.f32.mrb[6].mxu1  ;;  %2452 = vmatprep.subr.bf16.mxu0 %v2451_v63  ;;  %2516 = vmatprep.subr.bf16.mxu1 %v2515_v0 }
  0xef   : > { %v520_v11 = vadd.f32 %v519_v9, %v2999_v32  ;;  %v713_v12 = vadd.f32 %v712_v10, %v3001_v33  ;;  %v521_v13 = vpop.f32.mrb[7].mxu0  ;;  %v714_v14 = vpop.f32.mrb[7].mxu1  ;;  %2454 = vmatpush1.bf16.msra.mxu0 %v2453_v61  ;;  %2518 = vmatpush1.bf16.msra.mxu1 %v2517_v62  ;;  %v865_v17 = vmax.f32 %v516_v3, 0.0  ;;  %v867_v18 = vmax.f32 %v709_v4, 0.0 }
  0xf0   : > { %v522_v15 = vadd.f32 %v521_v13, %v3004_v34  ;;  %v715_v16 = vadd.f32 %v714_v14, %v3006_v35  ;;  %v866_v21 = vmax.f32 %v518_v7, 0.0  ;;  %v868_v22 = vmax.f32 %v711_v8, 0.0 }
  0xf1   : > { %v869_v19 = vmax.f32 %v520_v11, 0.0  ;;  %v871_v20 = vmax.f32 %v713_v12, 0.0 }
  0xf2   : > { %v870_v23 = vmax.f32 %v522_v15, 0.0  ;;  %v872_v24 = vmax.f32 %v715_v16, 0.0 }
  0xf3   : > { %v2457_v28 = vpack.c.bf16 %v869_v19, %v865_v17  ;;  %v2521_v29 = vpack.c.bf16 %v871_v20, %v867_v18 }
  0xf4   : > { %v2455_v31 = vpack.c.bf16 %v870_v23, %v866_v21  ;;  %v2519_v36 = vpack.c.bf16 %v872_v24, %v868_v22  ;;  %v525_v37 = vpop.f32.mrb[8].mxu0  ;;  %v718_v38 = vpop.f32.mrb[8].mxu1 }
  0xf5   : > { %v526_v39 = vadd.f32 %v525_v37, %v2999_v32  ;;  %v719_v40 = vadd.f32 %v718_v38, %v3001_v33  ;;  %v527_v41 = vpop.f32.mrb[9].mxu0  ;;  %v720_v42 = vpop.f32.mrb[9].mxu1 }
  0xf6   : > { %v528_v43 = vadd.f32 %v527_v41, %v3004_v34  ;;  %v721_v44 = vadd.f32 %v720_v42, %v3006_v35  ;;  %v529_v45 = vpop.f32.mrb[10].mxu0  ;;  %v722_v46 = vpop.f32.mrb[10].mxu1  ;;  %2456 = vmatprep.subr.bf16.mxu0 %v2455_v31  ;;  %2520 = vmatprep.subr.bf16.mxu1 %v2519_v36 }
  0xf7   : > { %v530_v47 = vadd.f32 %v529_v45, %v2999_v32  ;;  %v723_v48 = vadd.f32 %v722_v46, %v3001_v33  ;;  %v531_v49 = vpop.f32.mrb[11].mxu0  ;;  %v724_v50 = vpop.f32.mrb[11].mxu1  ;;  %2458 = vmatpush1.bf16.msra.mxu0 %v2457_v28  ;;  %2522 = vmatpush1.bf16.msra.mxu1 %v2521_v29  ;;  %v873_v53 = vmax.f32 %v526_v39, 0.0  ;;  %v875_v54 = vmax.f32 %v719_v40, 0.0 }
  0xf8   : > { %v532_v51 = vadd.f32 %v531_v49, %v3004_v34  ;;  %v725_v52 = vadd.f32 %v724_v50, %v3006_v35  ;;  %v874_v57 = vmax.f32 %v528_v43, 0.0  ;;  %v876_v58 = vmax.f32 %v721_v44, 0.0 }
  0xf9   : > { %v877_v55 = vmax.f32 %v530_v47, 0.0  ;;  %v879_v56 = vmax.f32 %v723_v48, 0.0 }
  0xfa   : > { %v878_v59 = vmax.f32 %v532_v51, 0.0  ;;  %v880_v61 = vmax.f32 %v725_v52, 0.0 }
  0xfb   : > { %v2461_v62 = vpack.c.bf16 %v877_v55, %v873_v53  ;;  %v2525_v63 = vpack.c.bf16 %v879_v56, %v875_v54 }
  0xfc   : > { %v2459_v0 = vpack.c.bf16 %v878_v59, %v874_v57  ;;  %v2523_v1 = vpack.c.bf16 %v880_v61, %v876_v58  ;;  %v535_v2 = vpop.f32.mrb[12].mxu0  ;;  %v728_v3 = vpop.f32.mrb[12].mxu1 }
  0xfd   : > { %v536_v4 = vadd.f32 %v535_v2, %v2999_v32  ;;  %v729_v5 = vadd.f32 %v728_v3, %v3001_v33  ;;  %v537_v6 = vpop.f32.mrb[13].mxu0  ;;  %v730_v7 = vpop.f32.mrb[13].mxu1 }
  0xfe   : > { %v538_v8 = vadd.f32 %v537_v6, %v3004_v34  ;;  %v731_v9 = vadd.f32 %v730_v7, %v3006_v35  ;;  %v539_v10 = vpop.f32.mrb[14].mxu0  ;;  %v732_v11 = vpop.f32.mrb[14].mxu1  ;;  %2460 = vmatprep.subr.bf16.mxu0 %v2459_v0  ;;  %2524 = vmatprep.subr.bf16.mxu1 %v2523_v1 }
  0xff   : > { %v540_v12 = vadd.f32 %v539_v10, %v2999_v32  ;;  %v733_v13 = vadd.f32 %v732_v11, %v3001_v33  ;;  %v541_v14 = vpop.f32.mrb[15].mxu0  ;;  %v734_v15 = vpop.f32.mrb[15].mxu1  ;;  %2462 = vmatpush1.bf16.msra.mxu0 %v2461_v62  ;;  %2526 = vmatpush1.bf16.msra.mxu1 %v2525_v63  ;;  %v881_v18 = vmax.f32 %v536_v4, 0.0  ;;  %v883_v19 = vmax.f32 %v729_v5, 0.0 }
 0x100   : > { %v542_v16 = vadd.f32 %v541_v14, %v3004_v34  ;;  %v735_v17 = vadd.f32 %v734_v15, %v3006_v35  ;;  %v882_v22 = vmax.f32 %v538_v8, 0.0  ;;  %v884_v23 = vmax.f32 %v731_v9, 0.0 }
 0x101   : > { %v885_v20 = vmax.f32 %v540_v12, 0.0  ;;  %v887_v21 = vmax.f32 %v733_v13, 0.0 }
 0x102   : > { %v886_v24 = vmax.f32 %v542_v16, 0.0  ;;  %v888_v28 = vmax.f32 %v735_v17, 0.0 }
 0x103   : > { %v2465_v29 = vpack.c.bf16 %v885_v20, %v881_v18  ;;  %v2529_v31 = vpack.c.bf16 %v887_v21, %v883_v19 }
 0x104   : > { %v2463_v36 = vpack.c.bf16 %v886_v24, %v882_v22  ;;  %v2527_v37 = vpack.c.bf16 %v888_v28, %v884_v23  ;;  %v545_v38 = vpop.f32.mrb[16].mxu0  ;;  %v738_v39 = vpop.f32.mrb[16].mxu1 }
 0x105   : > { %v546_v40 = vadd.f32 %v545_v38, %v2999_v32  ;;  %v739_v41 = vadd.f32 %v738_v39, %v3001_v33  ;;  %v547_v42 = vpop.f32.mrb[17].mxu0  ;;  %v740_v43 = vpop.f32.mrb[17].mxu1 }
 0x106   : > { %v548_v44 = vadd.f32 %v547_v42, %v3004_v34  ;;  %v741_v45 = vadd.f32 %v740_v43, %v3006_v35  ;;  %v549_v46 = vpop.f32.mrb[18].mxu0  ;;  %v742_v47 = vpop.f32.mrb[18].mxu1  ;;  %2464 = vmatprep.subr.bf16.mxu0 %v2463_v36  ;;  %2528 = vmatprep.subr.bf16.mxu1 %v2527_v37 }
 0x107   : > { %v550_v48 = vadd.f32 %v549_v46, %v2999_v32  ;;  %v743_v49 = vadd.f32 %v742_v47, %v3001_v33  ;;  %v551_v50 = vpop.f32.mrb[19].mxu0  ;;  %v744_v51 = vpop.f32.mrb[19].mxu1  ;;  %2466 = vmatpush1.bf16.msra.mxu0 %v2465_v29  ;;  %2530 = vmatpush1.bf16.msra.mxu1 %v2529_v31  ;;  %v889_v54 = vmax.f32 %v546_v40, 0.0  ;;  %v891_v55 = vmax.f32 %v739_v41, 0.0 }
 0x108   : > { %v552_v52 = vadd.f32 %v551_v50, %v3004_v34  ;;  %v745_v53 = vadd.f32 %v744_v51, %v3006_v35  ;;  %v890_v58 = vmax.f32 %v548_v44, 0.0  ;;  %v892_v59 = vmax.f32 %v741_v45, 0.0 }
 0x109   : > { %v893_v56 = vmax.f32 %v550_v48, 0.0  ;;  %v895_v57 = vmax.f32 %v743_v49, 0.0 }
 0x10a   : > { %v894_v61 = vmax.f32 %v552_v52, 0.0  ;;  %v896_v62 = vmax.f32 %v745_v53, 0.0 }
 0x10b   : > { %v2469_v63 = vpack.c.bf16 %v893_v56, %v889_v54  ;;  %v2533_v0 = vpack.c.bf16 %v895_v57, %v891_v55 }
 0x10c   : > { %v2467_v1 = vpack.c.bf16 %v894_v61, %v890_v58  ;;  %v2531_v2 = vpack.c.bf16 %v896_v62, %v892_v59  ;;  %v555_v3 = vpop.f32.mrb[20].mxu0  ;;  %v748_v4 = vpop.f32.mrb[20].mxu1 }
 0x10d   : > { %v556_v5 = vadd.f32 %v555_v3, %v2999_v32  ;;  %v749_v6 = vadd.f32 %v748_v4, %v3001_v33  ;;  %v557_v7 = vpop.f32.mrb[21].mxu0  ;;  %v750_v8 = vpop.f32.mrb[21].mxu1 }
 0x10e   : > { %v558_v9 = vadd.f32 %v557_v7, %v3004_v34  ;;  %v751_v10 = vadd.f32 %v750_v8, %v3006_v35  ;;  %v559_v11 = vpop.f32.mrb[22].mxu0  ;;  %v752_v12 = vpop.f32.mrb[22].mxu1  ;;  %2468 = vmatprep.subr.bf16.mxu0 %v2467_v1  ;;  %2532 = vmatprep.subr.bf16.mxu1 %v2531_v2 }
 0x10f   : > { %v560_v13 = vadd.f32 %v559_v11, %v2999_v32  ;;  %v753_v14 = vadd.f32 %v752_v12, %v3001_v33  ;;  %v561_v15 = vpop.f32.mrb[23].mxu0  ;;  %v754_v16 = vpop.f32.mrb[23].mxu1  ;;  %2470 = vmatpush1.bf16.msra.mxu0 %v2469_v63  ;;  %2534 = vmatpush1.bf16.msra.mxu1 %v2533_v0  ;;  %v897_v19 = vmax.f32 %v556_v5, 0.0  ;;  %v899_v20 = vmax.f32 %v749_v6, 0.0 }
 0x110   : > { %v562_v17 = vadd.f32 %v561_v15, %v3004_v34  ;;  %v755_v18 = vadd.f32 %v754_v16, %v3006_v35  ;;  %v898_v23 = vmax.f32 %v558_v9, 0.0  ;;  %v900_v24 = vmax.f32 %v751_v10, 0.0 }
 0x111   : > { %v901_v21 = vmax.f32 %v560_v13, 0.0  ;;  %v903_v22 = vmax.f32 %v753_v14, 0.0 }
 0x112   : > { %v902_v28 = vmax.f32 %v562_v17, 0.0  ;;  %v904_v29 = vmax.f32 %v755_v18, 0.0 }
 0x113   : > { %v2473_v31 = vpack.c.bf16 %v901_v21, %v897_v19  ;;  %v2537_v36 = vpack.c.bf16 %v903_v22, %v899_v20 }
 0x114   : > { %v2471_v37 = vpack.c.bf16 %v902_v28, %v898_v23  ;;  %v2535_v38 = vpack.c.bf16 %v904_v29, %v900_v24  ;;  %v565_v39 = vpop.f32.mrb[24].mxu0  ;;  %v758_v40 = vpop.f32.mrb[24].mxu1 }
 0x115   : > { %v566_v41 = vadd.f32 %v565_v39, %v2999_v32  ;;  %v759_v42 = vadd.f32 %v758_v40, %v3001_v33  ;;  %v567_v43 = vpop.f32.mrb[25].mxu0  ;;  %v760_v44 = vpop.f32.mrb[25].mxu1 }
 0x116   : > { %v568_v45 = vadd.f32 %v567_v43, %v3004_v34  ;;  %v761_v46 = vadd.f32 %v760_v44, %v3006_v35  ;;  %v569_v47 = vpop.f32.mrb[26].mxu0  ;;  %v762_v48 = vpop.f32.mrb[26].mxu1  ;;  %2472 = vmatprep.subr.bf16.mxu0 %v2471_v37  ;;  %2536 = vmatprep.subr.bf16.mxu1 %v2535_v38 }
 0x117   : > { %v570_v49 = vadd.f32 %v569_v47, %v2999_v32  ;;  %v763_v50 = vadd.f32 %v762_v48, %v3001_v33  ;;  %v571_v51 = vpop.f32.mrb[27].mxu0  ;;  %v764_v52 = vpop.f32.mrb[27].mxu1  ;;  %2474 = vmatpush1.bf16.msra.mxu0 %v2473_v31  ;;  %2538 = vmatpush1.bf16.msra.mxu1 %v2537_v36  ;;  %v905_v55 = vmax.f32 %v566_v41, 0.0  ;;  %v907_v56 = vmax.f32 %v759_v42, 0.0 }
 0x118   : > { %v572_v53 = vadd.f32 %v571_v51, %v3004_v34  ;;  %v765_v54 = vadd.f32 %v764_v52, %v3006_v35  ;;  %v906_v59 = vmax.f32 %v568_v45, 0.0  ;;  %v908_v61 = vmax.f32 %v761_v46, 0.0 }
 0x119   : > { %v909_v57 = vmax.f32 %v570_v49, 0.0  ;;  %v911_v58 = vmax.f32 %v763_v50, 0.0 }
 0x11a   : > { %v910_v62 = vmax.f32 %v572_v53, 0.0  ;;  %v912_v63 = vmax.f32 %v765_v54, 0.0 }
 0x11b   : > { %v2477_v0 = vpack.c.bf16 %v909_v57, %v905_v55  ;;  %v2541_v1 = vpack.c.bf16 %v911_v58, %v907_v56 }
 0x11c   : > { %v2475_v2 = vpack.c.bf16 %v910_v62, %v906_v59  ;;  %v2539_v3 = vpack.c.bf16 %v912_v63, %v908_v61  ;;  %v575_v4 = vpop.f32.mrb[28].mxu0  ;;  %v768_v5 = vpop.f32.mrb[28].mxu1 }
 0x11d   : > { %v576_v6 = vadd.f32 %v575_v4, %v2999_v32  ;;  %v769_v7 = vadd.f32 %v768_v5, %v3001_v33  ;;  %v577_v8 = vpop.f32.mrb[29].mxu0  ;;  %v770_v9 = vpop.f32.mrb[29].mxu1 }
 0x11e   : > { %v578_v10 = vadd.f32 %v577_v8, %v3004_v34  ;;  %v771_v11 = vadd.f32 %v770_v9, %v3006_v35  ;;  %v579_v12 = vpop.f32.mrb[30].mxu0  ;;  %v772_v13 = vpop.f32.mrb[30].mxu1  ;;  %2476 = vmatprep.subr.bf16.mxu0 %v2475_v2  ;;  %2540 = vmatprep.subr.bf16.mxu1 %v2539_v3 }
 0x11f   : > { %v580_v14 = vadd.f32 %v579_v12, %v2999_v32  ;;  %v773_v15 = vadd.f32 %v772_v13, %v3001_v33  ;;  %v581_v16 = vpop.f32.mrb[31].mxu0  ;;  %v774_v17 = vpop.f32.mrb[31].mxu1  ;;  %2478 = vmatpush1.bf16.msra.mxu0 %v2477_v0  ;;  %2542 = vmatpush1.bf16.msra.mxu1 %v2541_v1  ;;  %v913_v20 = vmax.f32 %v576_v6, 0.0  ;;  %v915_v21 = vmax.f32 %v769_v7, 0.0 }
 0x120   : > { %v582_v18 = vadd.f32 %v581_v16, %v3004_v34  ;;  %v775_v19 = vadd.f32 %v774_v17, %v3006_v35  ;;  %v914_v24 = vmax.f32 %v578_v10, 0.0  ;;  %v916_v28 = vmax.f32 %v771_v11, 0.0 }
 0x121   : > { %v917_v22 = vmax.f32 %v580_v14, 0.0  ;;  %v919_v23 = vmax.f32 %v773_v15, 0.0 }
 0x122   : > { %v918_v29 = vmax.f32 %v582_v18, 0.0  ;;  %v920_v31 = vmax.f32 %v775_v19, 0.0 }
 0x123   : > { %v2481_v36 = vpack.c.bf16 %v917_v22, %v913_v20  ;;  %v2545_v37 = vpack.c.bf16 %v919_v23, %v915_v21 }
 0x124   : > { %v2479_v38 = vpack.c.bf16 %v918_v29, %v914_v24  ;;  %v2543_v39 = vpack.c.bf16 %v920_v31, %v916_v28  ;;  %v585_v40 = vpop.f32.mrb[32].mxu0  ;;  %v778_v41 = vpop.f32.mrb[32].mxu1 }
 0x125   : > { %v586_v42 = vadd.f32 %v585_v40, %v2999_v32  ;;  %v779_v43 = vadd.f32 %v778_v41, %v3001_v33  ;;  %v587_v44 = vpop.f32.mrb[33].mxu0  ;;  %v780_v45 = vpop.f32.mrb[33].mxu1 }
 0x126   : > { %v588_v46 = vadd.f32 %v587_v44, %v3004_v34  ;;  %v781_v47 = vadd.f32 %v780_v45, %v3006_v35  ;;  %v589_v48 = vpop.f32.mrb[34].mxu0  ;;  %v782_v49 = vpop.f32.mrb[34].mxu1  ;;  %2480 = vmatprep.subr.bf16.mxu0 %v2479_v38  ;;  %2544 = vmatprep.subr.bf16.mxu1 %v2543_v39 }
 0x127   : > { %v590_v50 = vadd.f32 %v589_v48, %v2999_v32  ;;  %v783_v51 = vadd.f32 %v782_v49, %v3001_v33  ;;  %v591_v52 = vpop.f32.mrb[35].mxu0  ;;  %v784_v53 = vpop.f32.mrb[35].mxu1  ;;  %2482 = vmatpush1.bf16.msra.mxu0 %v2481_v36  ;;  %2546 = vmatpush1.bf16.msra.mxu1 %v2545_v37  ;;  %v921_v56 = vmax.f32 %v586_v42, 0.0  ;;  %v923_v57 = vmax.f32 %v779_v43, 0.0 }
 0x128   : > { %v592_v54 = vadd.f32 %v591_v52, %v3004_v34  ;;  %v785_v55 = vadd.f32 %v784_v53, %v3006_v35  ;;  %v922_v61 = vmax.f32 %v588_v46, 0.0  ;;  %v924_v62 = vmax.f32 %v781_v47, 0.0 }
 0x129   : > { %v925_v58 = vmax.f32 %v590_v50, 0.0  ;;  %v927_v59 = vmax.f32 %v783_v51, 0.0 }
 0x12a   : > { %v926_v63 = vmax.f32 %v592_v54, 0.0  ;;  %v928_v0 = vmax.f32 %v785_v55, 0.0 }
 0x12b   : > { %v2485_v1 = vpack.c.bf16 %v925_v58, %v921_v56  ;;  %v2549_v2 = vpack.c.bf16 %v927_v59, %v923_v57 }
 0x12c   : > { %v2483_v3 = vpack.c.bf16 %v926_v63, %v922_v61  ;;  %v2547_v4 = vpack.c.bf16 %v928_v0, %v924_v62  ;;  %v595_v5 = vpop.f32.mrb[36].mxu0  ;;  %v788_v6 = vpop.f32.mrb[36].mxu1 }
 0x12d   : > { %v596_v7 = vadd.f32 %v595_v5, %v2999_v32  ;;  %v789_v8 = vadd.f32 %v788_v6, %v3001_v33  ;;  %v597_v9 = vpop.f32.mrb[37].mxu0  ;;  %v790_v10 = vpop.f32.mrb[37].mxu1 }
 0x12e   : > { %v598_v11 = vadd.f32 %v597_v9, %v3004_v34  ;;  %v791_v12 = vadd.f32 %v790_v10, %v3006_v35  ;;  %v599_v13 = vpop.f32.mrb[38].mxu0  ;;  %v792_v14 = vpop.f32.mrb[38].mxu1  ;;  %2484 = vmatprep.subr.bf16.mxu0 %v2483_v3  ;;  %2548 = vmatprep.subr.bf16.mxu1 %v2547_v4 }
 0x12f   : > { %v600_v15 = vadd.f32 %v599_v13, %v2999_v32  ;;  %v793_v16 = vadd.f32 %v792_v14, %v3001_v33  ;;  %v601_v17 = vpop.f32.mrb[39].mxu0  ;;  %v794_v18 = vpop.f32.mrb[39].mxu1  ;;  %2486 = vmatpush1.bf16.msra.mxu0 %v2485_v1  ;;  %2550 = vmatpush1.bf16.msra.mxu1 %v2549_v2  ;;  %v929_v21 = vmax.f32 %v596_v7, 0.0  ;;  %v931_v22 = vmax.f32 %v789_v8, 0.0 }
 0x130   : > { %v602_v19 = vadd.f32 %v601_v17, %v3004_v34  ;;  %v795_v20 = vadd.f32 %v794_v18, %v3006_v35  ;;  %v930_v28 = vmax.f32 %v598_v11, 0.0  ;;  %v932_v29 = vmax.f32 %v791_v12, 0.0 }
 0x131   : > { %v933_v23 = vmax.f32 %v600_v15, 0.0  ;;  %v935_v24 = vmax.f32 %v793_v16, 0.0 }
 0x132   : > { %v934_v31 = vmax.f32 %v602_v19, 0.0  ;;  %v936_v36 = vmax.f32 %v795_v20, 0.0 }
 0x133   : > { %v2489_v37 = vpack.c.bf16 %v933_v23, %v929_v21  ;;  %v2553_v38 = vpack.c.bf16 %v935_v24, %v931_v22 }
 0x134   : > { %v2487_v39 = vpack.c.bf16 %v934_v31, %v930_v28  ;;  %v2551_v40 = vpack.c.bf16 %v936_v36, %v932_v29  ;;  %v605_v41 = vpop.f32.mrb[40].mxu0  ;;  %v798_v42 = vpop.f32.mrb[40].mxu1 }
 0x135   : > { %v606_v43 = vadd.f32 %v605_v41, %v2999_v32  ;;  %v799_v44 = vadd.f32 %v798_v42, %v3001_v33  ;;  %v607_v45 = vpop.f32.mrb[41].mxu0  ;;  %v800_v46 = vpop.f32.mrb[41].mxu1 }
 0x136   : > { %v608_v47 = vadd.f32 %v607_v45, %v3004_v34  ;;  %v801_v48 = vadd.f32 %v800_v46, %v3006_v35  ;;  %v609_v49 = vpop.f32.mrb[42].mxu0  ;;  %v802_v50 = vpop.f32.mrb[42].mxu1  ;;  %2488 = vmatprep.subr.bf16.mxu0 %v2487_v39  ;;  %2552 = vmatprep.subr.bf16.mxu1 %v2551_v40 }
 0x137   : > { %v610_v51 = vadd.f32 %v609_v49, %v2999_v32  ;;  %v803_v52 = vadd.f32 %v802_v50, %v3001_v33  ;;  %v611_v53 = vpop.f32.mrb[43].mxu0  ;;  %v804_v54 = vpop.f32.mrb[43].mxu1  ;;  %2490 = vmatpush1.bf16.msra.mxu0 %v2489_v37  ;;  %2554 = vmatpush1.bf16.msra.mxu1 %v2553_v38  ;;  %v937_v57 = vmax.f32 %v606_v43, 0.0  ;;  %v939_v58 = vmax.f32 %v799_v44, 0.0 }
 0x138   : > { %v612_v55 = vadd.f32 %v611_v53, %v3004_v34  ;;  %v805_v56 = vadd.f32 %v804_v54, %v3006_v35  ;;  %v938_v62 = vmax.f32 %v608_v47, 0.0  ;;  %v940_v63 = vmax.f32 %v801_v48, 0.0 }
 0x139   : > { %v941_v59 = vmax.f32 %v610_v51, 0.0  ;;  %v943_v61 = vmax.f32 %v803_v52, 0.0 }
 0x13a   : > { %v942_v0 = vmax.f32 %v612_v55, 0.0  ;;  %v944_v1 = vmax.f32 %v805_v56, 0.0 }
 0x13b   : > { %v2493_v2 = vpack.c.bf16 %v941_v59, %v937_v57  ;;  %v2557_v3 = vpack.c.bf16 %v943_v61, %v939_v58 }
 0x13c   : > { %v2491_v4 = vpack.c.bf16 %v942_v0, %v938_v62  ;;  %v2555_v5 = vpack.c.bf16 %v944_v1, %v940_v63  ;;  %v615_v6 = vpop.f32.mrb[44].mxu0  ;;  %v808_v7 = vpop.f32.mrb[44].mxu1 }
 0x13d   : > { %v616_v8 = vadd.f32 %v615_v6, %v2999_v32  ;;  %v809_v9 = vadd.f32 %v808_v7, %v3001_v33  ;;  %v617_v10 = vpop.f32.mrb[45].mxu0  ;;  %v810_v11 = vpop.f32.mrb[45].mxu1 }
 0x13e   : > { %v618_v12 = vadd.f32 %v617_v10, %v3004_v34  ;;  %v811_v13 = vadd.f32 %v810_v11, %v3006_v35  ;;  %v619_v14 = vpop.f32.mrb[46].mxu0  ;;  %v812_v15 = vpop.f32.mrb[46].mxu1  ;;  %2492 = vmatprep.subr.bf16.mxu0 %v2491_v4  ;;  %2556 = vmatprep.subr.bf16.mxu1 %v2555_v5 }
 0x13f   : > { %v620_v16 = vadd.f32 %v619_v14, %v2999_v32  ;;  %v813_v17 = vadd.f32 %v812_v15, %v3001_v33  ;;  %v621_v18 = vpop.f32.mrb[47].mxu0  ;;  %v814_v19 = vpop.f32.mrb[47].mxu1  ;;  %2494 = vmatpush1.bf16.msra.mxu0 %v2493_v2  ;;  %2558 = vmatpush1.bf16.msra.mxu1 %v2557_v3  ;;  %v945_v22 = vmax.f32 %v616_v8, 0.0  ;;  %v947_v23 = vmax.f32 %v809_v9, 0.0 }
 0x140   : > { %v622_v20 = vadd.f32 %v621_v18, %v3004_v34  ;;  %v815_v21 = vadd.f32 %v814_v19, %v3006_v35  ;;  %v946_v29 = vmax.f32 %v618_v12, 0.0  ;;  %v948_v31 = vmax.f32 %v811_v13, 0.0 }
 0x141   : > { %v949_v24 = vmax.f32 %v620_v16, 0.0  ;;  %v951_v28 = vmax.f32 %v813_v17, 0.0 }
 0x142   : > { %v950_v36 = vmax.f32 %v622_v20, 0.0  ;;  %v952_v37 = vmax.f32 %v815_v21, 0.0 }
 0x143   : > { %v2497_v38 = vpack.c.bf16 %v949_v24, %v945_v22  ;;  %v2561_v39 = vpack.c.bf16 %v951_v28, %v947_v23 }
 0x144   : > { %v2495_v40 = vpack.c.bf16 %v950_v36, %v946_v29  ;;  %v2559_v41 = vpack.c.bf16 %v952_v37, %v948_v31  ;;  %v625_v42 = vpop.f32.mrb[48].mxu0  ;;  %v818_v43 = vpop.f32.mrb[48].mxu1 }
 0x145   : > { %v626_v44 = vadd.f32 %v625_v42, %v2999_v32  ;;  %v819_v45 = vadd.f32 %v818_v43, %v3001_v33  ;;  %v627_v46 = vpop.f32.mrb[49].mxu0  ;;  %v820_v47 = vpop.f32.mrb[49].mxu1 }
 0x146   : > { %v628_v48 = vadd.f32 %v627_v46, %v3004_v34  ;;  %v821_v49 = vadd.f32 %v820_v47, %v3006_v35  ;;  %v629_v50 = vpop.f32.mrb[50].mxu0  ;;  %v822_v51 = vpop.f32.mrb[50].mxu1  ;;  %2496 = vmatprep.subr.bf16.mxu0 %v2495_v40  ;;  %2560 = vmatprep.subr.bf16.mxu1 %v2559_v41 }
 0x147   : > { %v630_v52 = vadd.f32 %v629_v50, %v2999_v32  ;;  %v823_v53 = vadd.f32 %v822_v51, %v3001_v33  ;;  %v631_v54 = vpop.f32.mrb[51].mxu0  ;;  %v824_v55 = vpop.f32.mrb[51].mxu1  ;;  %2498 = vmatpush1.bf16.msra.mxu0 %v2497_v38  ;;  %2562 = vmatpush1.bf16.msra.mxu1 %v2561_v39  ;;  %v953_v58 = vmax.f32 %v626_v44, 0.0  ;;  %v955_v59 = vmax.f32 %v819_v45, 0.0 }
 0x148   : > { %v632_v56 = vadd.f32 %v631_v54, %v3004_v34  ;;  %v825_v57 = vadd.f32 %v824_v55, %v3006_v35  ;;  %v954_v63 = vmax.f32 %v628_v48, 0.0  ;;  %v956_v0 = vmax.f32 %v821_v49, 0.0 }
 0x149   : > { %v957_v61 = vmax.f32 %v630_v52, 0.0  ;;  %v959_v62 = vmax.f32 %v823_v53, 0.0 }
 0x14a   : > { %v958_v1 = vmax.f32 %v632_v56, 0.0  ;;  %v960_v2 = vmax.f32 %v825_v57, 0.0 }
 0x14b   : > { %v2501_v3 = vpack.c.bf16 %v957_v61, %v953_v58  ;;  %v2565_v4 = vpack.c.bf16 %v959_v62, %v955_v59 }
 0x14c   : > { %v2499_v5 = vpack.c.bf16 %v958_v1, %v954_v63  ;;  %v2563_v6 = vpack.c.bf16 %v960_v2, %v956_v0  ;;  %v635_v7 = vpop.f32.mrb[52].mxu0  ;;  %v828_v8 = vpop.f32.mrb[52].mxu1 }
 0x14d   : > { %v636_v9 = vadd.f32 %v635_v7, %v2999_v32  ;;  %v829_v10 = vadd.f32 %v828_v8, %v3001_v33  ;;  %v637_v11 = vpop.f32.mrb[53].mxu0  ;;  %v830_v12 = vpop.f32.mrb[53].mxu1 }
 0x14e   : > { %v638_v13 = vadd.f32 %v637_v11, %v3004_v34  ;;  %v831_v14 = vadd.f32 %v830_v12, %v3006_v35  ;;  %v639_v15 = vpop.f32.mrb[54].mxu0  ;;  %v832_v16 = vpop.f32.mrb[54].mxu1  ;;  %2500 = vmatprep.subr.bf16.mxu0 %v2499_v5  ;;  %2564 = vmatprep.subr.bf16.mxu1 %v2563_v6 }
 0x14f   : > { %v640_v17 = vadd.f32 %v639_v15, %v2999_v32  ;;  %v833_v18 = vadd.f32 %v832_v16, %v3001_v33  ;;  %v641_v19 = vpop.f32.mrb[55].mxu0  ;;  %v834_v20 = vpop.f32.mrb[55].mxu1  ;;  %2502 = vmatpush1.bf16.msra.mxu0 %v2501_v3  ;;  %2566 = vmatpush1.bf16.msra.mxu1 %v2565_v4  ;;  %v961_v23 = vmax.f32 %v636_v9, 0.0  ;;  %v963_v24 = vmax.f32 %v829_v10, 0.0 }
 0x150   : > { %v642_v21 = vadd.f32 %v641_v19, %v3004_v34  ;;  %v835_v22 = vadd.f32 %v834_v20, %v3006_v35  ;;  %v962_v31 = vmax.f32 %v638_v13, 0.0  ;;  %v964_v36 = vmax.f32 %v831_v14, 0.0 }
 0x151   : > { %v965_v28 = vmax.f32 %v640_v17, 0.0  ;;  %v967_v29 = vmax.f32 %v833_v18, 0.0 }
 0x152   : > { %v966_v37 = vmax.f32 %v642_v21, 0.0  ;;  %v968_v38 = vmax.f32 %v835_v22, 0.0 }
 0x153   : > { %v2505_v39 = vpack.c.bf16 %v965_v28, %v961_v23  ;;  %v2569_v40 = vpack.c.bf16 %v967_v29, %v963_v24 }
 0x154   : > { %v2503_v41 = vpack.c.bf16 %v966_v37, %v962_v31  ;;  %v2567_v42 = vpack.c.bf16 %v968_v38, %v964_v36  ;;  %v645_v43 = vpop.f32.mrb[56].mxu0  ;;  %v838_v44 = vpop.f32.mrb[56].mxu1 }
 0x155   : > { %v646_v45 = vadd.f32 %v645_v43, %v2999_v32  ;;  %v839_v46 = vadd.f32 %v838_v44, %v3001_v33  ;;  %v647_v47 = vpop.f32.mrb[57].mxu0  ;;  %v840_v48 = vpop.f32.mrb[57].mxu1 }
 0x156   : > { %v648_v49 = vadd.f32 %v647_v47, %v3004_v34  ;;  %v841_v50 = vadd.f32 %v840_v48, %v3006_v35  ;;  %v649_v51 = vpop.f32.mrb[58].mxu0  ;;  %v842_v52 = vpop.f32.mrb[58].mxu1  ;;  %2504 = vmatprep.subr.bf16.mxu0 %v2503_v41  ;;  %2568 = vmatprep.subr.bf16.mxu1 %v2567_v42 }
 0x157   : > { %v650_v53 = vadd.f32 %v649_v51, %v2999_v32  ;;  %v843_v54 = vadd.f32 %v842_v52, %v3001_v33  ;;  %v651_v55 = vpop.f32.mrb[59].mxu0  ;;  %v844_v56 = vpop.f32.mrb[59].mxu1  ;;  %2506 = vmatpush1.bf16.msra.mxu0 %v2505_v39  ;;  %2570 = vmatpush1.bf16.msra.mxu1 %v2569_v40  ;;  %v969_v59 = vmax.f32 %v646_v45, 0.0  ;;  %v971_v61 = vmax.f32 %v839_v46, 0.0 }
 0x158   : > { %v652_v57 = vadd.f32 %v651_v55, %v3004_v34  ;;  %v845_v58 = vadd.f32 %v844_v56, %v3006_v35  ;;  %v970_v0 = vmax.f32 %v648_v49, 0.0  ;;  %v972_v1 = vmax.f32 %v841_v50, 0.0  ;;  %v1182_v55 = vld [vmem:[%s3568_s4] sm:$0xff] (!%p2310_p4) }
 0x159   : > { %v973_v62 = vmax.f32 %v650_v53, 0.0  ;;  %v975_v63 = vmax.f32 %v843_v54, 0.0  ;;  %v1183_v53 = vld [vmem:[%s3568_s4 + $0x8] sm:$0xff] (!%p2310_p4)  ;;  %v1185_v54 = vld [vmem:[%s3568_s4 + $0x18] sm:$0xff] (!%p2310_p4) }
 0x15a   : > { %v974_v2 = vmax.f32 %v652_v57, 0.0  ;;  %v976_v3 = vmax.f32 %v845_v58, 0.0  ;;  %v2579_v56 = vpack.c.bf16 (!%p2310_p4), %v1185_v54, %v1183_v53  ;;  %v1187_v57 = vld [vmem:[%s3568_s4 + $0x28] sm:$0xff] (!%p2310_p4)  ;;  %v1189_v58 = vld [vmem:[%s3568_s4 + $0x38] sm:$0xff] (!%p2310_p4) }
 0x15b   : > { %v2509_v4 = vpack.c.bf16 %v973_v62, %v969_v59  ;;  %v2573_v5 = vpack.c.bf16 %v975_v63, %v971_v61  ;;  %v2828_v59 = vmov (!%p2310_p4), 0.0   ;;  %v2581_v61 = vpack.c.bf16 (!%p2310_p4), %v1184_v25, %v1182_v55  ;;  %v1186_v63 = vld [vmem:[%s3568_s4 + $0x20] sm:$0xff] (!%p2310_p4)  ;;  %v2748_v55 = vld [vmem:[%s3566_s2 + $0x234] ss:$8 sps:$4 sm:$0xff] (!%p2310_p4)   ;;  %v2746_v25 = vld [vmem:[%s3566_s2 + $0x230] ss:$8 sps:$4 sm:$0xff] (!%p2310_p4)  }
 0x15c   : > { %v2507_v6 = vpack.c.bf16 %v974_v2, %v970_v0  ;;  %v2571_v7 = vpack.c.bf16 %v976_v3, %v972_v1  ;;  %v655_v8 = vpop.f32.mrb[60].mxu0  ;;  %v848_v9 = vpop.f32.mrb[60].mxu1  ;;  %v2583_v62 = vpack.c.bf16 (!%p2310_p4), %v1189_v58, %v1187_v57  ;;  %v1188_v0 = vld [vmem:[%s3568_s4 + $0x30] sm:$0xff] (!%p2310_p4)  ;;  %v1191_v1 = vld [vmem:[%s3568_s4 + $0x48] sm:$0xff] (!%p2310_p4)  ;;  %v1193_v2 = vld [vmem:[%s3568_s4 + $0x58] sm:$0xff] (!%p2310_p4) }
 0x15d   : > { %v656_v10 = vadd.f32 %v655_v8, %v2999_v32  ;;  %v849_v11 = vadd.f32 %v848_v9, %v3001_v33  ;;  %v657_v12 = vpop.f32.mrb[61].mxu0  ;;  %v850_v13 = vpop.f32.mrb[61].mxu1  ;;  %v2585_v3 = vpack.c.bf16 (!%p2310_p4), %v1188_v0, %v1186_v63  ;;  %v1197_v8 = vld [vmem:[%s3568_s4 + $0x78] sm:$0xff] (!%p2310_p4)  ;;  %v2641_v9 = vld [vmem:[%s3566_s2 + $0x4] ss:$8 sps:$4 sm:$0xff] (!%p2310_p4)  }
 0x15e   : > { %v658_v14 = vadd.f32 %v657_v12, %v3004_v34  ;;  %v851_v15 = vadd.f32 %v850_v13, %v3006_v35  ;;  %v659_v16 = vpop.f32.mrb[62].mxu0  ;;  %v852_v17 = vpop.f32.mrb[62].mxu1  ;;  %2508 = vmatprep.subr.bf16.mxu0 %v2507_v6  ;;  %2572 = vmatprep.subr.bf16.mxu1 %v2571_v7  ;;  %v2587_v6 = vpack.c.bf16 (!%p2310_p4), %v1193_v2, %v1191_v1  ;;  %v1195_v7 = vld [vmem:[%s3568_s4 + $0x68] sm:$0xff] (!%p2310_p4)  ;;  %v1194_v13 = vld [vmem:[%s3568_s4 + $0x60] sm:$0xff] (!%p2310_p4)  ;;  %v2686_v57 = vld [vmem:[%s3566_s2 + $0xf4] ss:$8 sps:$4 sm:$0xff] (!%p2310_p4)  }
 0x15f   : > { %v660_v18 = vadd.f32 %v659_v16, %v2999_v32  ;;  %v853_v19 = vadd.f32 %v852_v17, %v3001_v33  ;;  %v661_v20 = vpop.f32.mrb[63].mxu0  ;;  %v854_v21 = vpop.f32.mrb[63].mxu1  ;;  %2510 = vmatpush1.bf16.msra.mxu0 %v2509_v4  ;;  %2574 = vmatpush1.bf16.msra.mxu1 %v2573_v5  ;;  %v977_v24 = vmax.f32 %v656_v10, 0.0  ;;  %v979_v28 = vmax.f32 %v849_v11, 0.0  ;;  %v1190_v4 = vld [vmem:[%s3568_s4 + $0x40] sm:$0xff] (!%p2310_p4)  ;;  %v1192_v5 = vld [vmem:[%s3568_s4 + $0x50] sm:$0xff] (!%p2310_p4) }
 0x160   : > { %v662_v22 = vadd.f32 %v661_v20, %v3004_v34  ;;  %v855_v23 = vadd.f32 %v854_v21, %v3006_v35  ;;  %v978_v36 = vmax.f32 %v658_v14, 0.0  ;;  %v980_v37 = vmax.f32 %v851_v15, 0.0  ;;  %v2643_v10 = vld [vmem:[%s3566_s2] ss:$8 sps:$4 sm:$0xff] (!%p2310_p4)   ;;  %v2644_v11 = vld [vmem:[%s3566_s2 + $0x14] ss:$8 sps:$4 sm:$0xff] (!%p2310_p4)  }
 0x161   : > { %v981_v29 = vmax.f32 %v660_v18, 0.0  ;;  %v983_v31 = vmax.f32 %v853_v19, 0.0  ;;  %v2827_v34 = vmov 1966171168   ;;  %v2589_v12 = vpack.c.bf16 (!%p2310_p4), %v1192_v5, %v1190_v4  ;;  %v1196_v15 = vld [vmem:[%s3568_s4 + $0x70] sm:$0xff] (!%p2310_p4)  ;;  %v1181_v21 = vld [vmem:[%s3569_s5 + $0x20] sm:$0xff] (!%p2310_p4) }
 0x162   : > { %v982_v38 = vmax.f32 %v662_v22, 0.0  ;;  %v984_v39 = vmax.f32 %v855_v23, 0.0  ;;  %v1134_v35 = vunpack.c.l.s4 %v2827_v34  ;;  %v2591_v14 = vpack.c.bf16 (!%p2310_p4), %v1197_v8, %v1195_v7  ;;  %v2646_v16 = vld [vmem:[%s3566_s2 + $0x10] ss:$8 sps:$4 sm:$0xff] (!%p2310_p4)   ;;  %v2647_v17 = vld [vmem:[%s3566_s2 + $0x24] ss:$8 sps:$4 sm:$0xff] (!%p2310_p4)  }
 0x163   : > { %v2513_v32 = vpack.c.bf16 %v981_v29, %v977_v24  ;;  %v2577_v40 = vpack.c.bf16 %v983_v31, %v979_v28  ;;  %v2593_v18 = vpack.c.bf16 (!%p2310_p4), %v1196_v15, %v1194_v13  ;;  %v2649_v19 = vld [vmem:[%s3566_s2 + $0x20] ss:$8 sps:$4 sm:$0xff] (!%p2310_p4)   ;;  %v2650_v20 = vld [vmem:[%s3566_s2 + $0x34] ss:$8 sps:$4 sm:$0xff] (!%p2310_p4)   ;;  %v2652_v22 = vld [vmem:[%s3566_s2 + $0x30] ss:$8 sps:$4 sm:$0xff] (!%p2310_p4)  }
 0x164   : > { %v2511_v33 = vpack.c.bf16 %v982_v38, %v978_v36  ;;  %v2575_v41 = vpack.c.bf16 %v984_v39, %v980_v37  ;;  %v1135_v42 = vunpack.c.0.s8 %v1134_v35  ;;  %v2653_v23 = vld [vmem:[%s3566_s2 + $0x44] ss:$8 sps:$4 sm:$0xff] (!%p2310_p4)   ;;  %v2655_v24 = vld [vmem:[%s3566_s2 + $0x40] ss:$8 sps:$4 sm:$0xff] (!%p2310_p4)   ;;  %v2656_v28 = vld [vmem:[%s3566_s2 + $0x54] ss:$8 sps:$4 sm:$0xff] (!%p2310_p4)  }
 0x165   : > { %v2658_v29 = vld [vmem:[%s3566_s2 + $0x50] ss:$8 sps:$4 sm:$0xff] (!%p2310_p4)   ;;  %v2659_v31 = vld [vmem:[%s3566_s2 + $0x64] ss:$8 sps:$4 sm:$0xff] (!%p2310_p4)   ;;  %v2661_v38 = vld [vmem:[%s3566_s2 + $0x60] ss:$8 sps:$4 sm:$0xff] (!%p2310_p4)  }
 0x166   : > { %2512 = vmatprep.subr.bf16.mxu0 %v2511_v33  ;;  %2576 = vmatprep.subr.bf16.mxu1 %v2575_v41  ;;  %v1138_v45 = vsub.s32 %v1135_v42, %v2985_v26  ;;  %v2662_v39 = vld [vmem:[%s3566_s2 + $0x74] ss:$8 sps:$4 sm:$0xff] (!%p2310_p4)   ;;  %v2667_v33 = vld [vmem:[%s3566_s2 + $0x80] ss:$8 sps:$4 sm:$0xff] (!%p2310_p4)   ;;  %v2670_v34 = vld [vmem:[%s3566_s2 + $0x90] ss:$8 sps:$4 sm:$0xff] (!%p2310_p4)  }
 0x167   : > { %2514 = vmatpush1.bf16.msra.mxu0 %v2513_v32  ;;  %2578 = vmatpush1.bf16.msra.mxu1 %v2577_v40  ;;  %v2664_v32 = vld [vmem:[%s3566_s2 + $0x70] ss:$8 sps:$4 sm:$0xff] (!%p2310_p4)   ;;  %v2665_v40 = vld [vmem:[%s3566_s2 + $0x84] ss:$8 sps:$4 sm:$0xff] (!%p2310_p4)   ;;  %v2668_v41 = vld [vmem:[%s3566_s2 + $0x94] ss:$8 sps:$4 sm:$0xff] (!%p2310_p4)  }
 0x168   : > { %2580 = vmatprep.subr.bf16.mxu0 (!%p2310_p4), %v2579_v56  ;;  %1676 = vmatprep.subr.bf16.mxu1 (!%p2310_p4), %v2641_v9  ;;  %v2671_v35 = vld [vmem:[%s3566_s2 + $0xa4] ss:$8 sps:$4 sm:$0xff] (!%p2310_p4)   ;;  %v2673_v42 = vld [vmem:[%s3566_s2 + $0xa0] ss:$8 sps:$4 sm:$0xff] (!%p2310_p4)   ;;  %v2754_v1 = vld [vmem:[%s3566_s2 + $0x254] ss:$8 sps:$4 sm:$0xff] (!%p2310_p4)  }
 0x169   : > { %v2743_v53 = vld [vmem:[%s3566_s2 + $0x220] ss:$8 sps:$4 sm:$0xff] (!%p2310_p4)   ;;  %v2683_v54 = vld [vmem:[%s3566_s2 + $0xe4] ss:$8 sps:$4 sm:$0xff] (!%p2310_p4)   ;;  %v2694_v4 = vld [vmem:[%s3566_s2 + $0x114] ss:$8 sps:$4 sm:$0xff] (!%p2310_p4)  }
 0x16a   : > { %1050 = vmatmul.mubr.f32.vlgmr.msra.gmra.mrb[64].mxu0 %v2826_v60  ;;  %1121 = vmatmul.mubr.f32.vlgmr.msra.gmra.mrb[64].mxu1 %v2826_v60  ;;  %v2685_v56 = vld [vmem:[%s3566_s2 + $0xe0] ss:$8 sps:$4 sm:$0xff] (!%p2310_p4)   ;;  %v2751_v58 = vld [vmem:[%s3566_s2 + $0x244] ss:$8 sps:$4 sm:$0xff] (!%p2310_p4)   ;;  %v2692_v8 = vld [vmem:[%s3566_s2 + $0x110] ss:$8 sps:$4 sm:$0xff] (!%p2310_p4)  }
 0x16b   : > { %1266 = vmatprep.mubr.f32.mxu0 (!%p2310_p4), %v2828_v59  ;;  %2582 = vmatpush1.bf16.msra.mxu0 (!%p2310_p4), %v2581_v61  ;;  %v2688_v59 = vld [vmem:[%s3566_s2 + $0xf0] ss:$8 sps:$4 sm:$0xff] (!%p2310_p4)   ;;  %v2691_v61 = vld [vmem:[%s3566_s2 + $0x104] ss:$8 sps:$4 sm:$0xff] (!%p2310_p4)   ;;  %v2749_v63 = vld [vmem:[%s3566_s2 + $0x240] ss:$8 sps:$4 sm:$0xff] (!%p2310_p4)  }
 0x16c   : > { %2584 = vmatprep.subr.bf16.mxu0 (!%p2310_p4), %v2583_v62  ;;  %1677 = vmatpush1.bf16.msra.mxu1 (!%p2310_p4), %v2643_v10  ;;  %v2689_v2 = vld [vmem:[%s3566_s2 + $0x100] ss:$8 sps:$4 sm:$0xff] (!%p2310_p4)   ;;  %v2757_v7 = vld [vmem:[%s3566_s2 + $0x264] ss:$8 sps:$4 sm:$0xff] (!%p2310_p4)   ;;  %v2700_v13 = vld [vmem:[%s3566_s2 + $0x134] ss:$8 sps:$4 sm:$0xff] (!%p2310_p4)  }
 0x16d   : > { %1678 = vmatprep.subr.bf16.mxu1 (!%p2310_p4), %v2644_v11  ;;  %v2697_v9 = vld [vmem:[%s3566_s2 + $0x124] ss:$8 sps:$4 sm:$0xff] (!%p2310_p4)   ;;  %v2755_v10 = vld [vmem:[%s3566_s2 + $0x260] ss:$8 sps:$4 sm:$0xff] (!%p2310_p4)   ;;  %v2760_v11 = vld [vmem:[%s3566_s2 + $0x274] ss:$8 sps:$4 sm:$0xff] (!%p2310_p4)  }
 0x16e   : > { %v2763_v15 = vld [vmem:[%s3566_s2 + $0x284] ss:$8 sps:$4 sm:$0xff] (!%p2310_p4)  }
 0x16f   : > { %2586 = vmatpush1.bf16.msra.mxu0 (!%p2310_p4), %v2585_v3 }
 0x170   : > { %2588 = vmatprep.subr.bf16.mxu0 (!%p2310_p4), %v2587_v6  ;;  %1679 = vmatpush1.bf16.msra.mxu1 (!%p2310_p4), %v2646_v16  ;;  %v2752_v6 = vld [vmem:[%s3566_s2 + $0x250] ss:$8 sps:$4 sm:$0xff] (!%p2310_p4)  }
 0x171   : > { %1680 = vmatprep.subr.bf16.mxu1 (!%p2310_p4), %v2647_v17  ;;  %v2698_v16 = vld [vmem:[%s3566_s2 + $0x130] ss:$8 sps:$4 sm:$0xff] (!%p2310_p4)   ;;  %v2703_v17 = vld [vmem:[%s3566_s2 + $0x144] ss:$8 sps:$4 sm:$0xff] (!%p2310_p4)  }
 0x173   : > { %2590 = vmatpush1.bf16.msra.mxu0 (!%p2310_p4), %v2589_v12  ;;  %v2695_v12 = vld [vmem:[%s3566_s2 + $0x120] ss:$8 sps:$4 sm:$0xff] (!%p2310_p4)  }
 0x174   : > { %2592 = vmatprep.subr.bf16.mxu0 (!%p2310_p4), %v2591_v14  ;;  %1681 = vmatpush1.bf16.msra.mxu1 (!%p2310_p4), %v2649_v19  ;;  %v2758_v14 = vld [vmem:[%s3566_s2 + $0x270] ss:$8 sps:$4 sm:$0xff] (!%p2310_p4)   ;;  %v2766_v19 = vld [vmem:[%s3566_s2 + $0x294] ss:$8 sps:$4 sm:$0xff] (!%p2310_p4)  }
 0x175   : > { %1682 = vmatprep.subr.bf16.mxu1 (!%p2310_p4), %v2650_v20  ;;  %v2701_v20 = vld [vmem:[%s3566_s2 + $0x140] ss:$8 sps:$4 sm:$0xff] (!%p2310_p4)  }
 0x177   : > { %2594 = vmatpush1.bf16.msra.mxu0 (!%p2310_p4), %v2593_v18  ;;  %v2761_v18 = vld [vmem:[%s3566_s2 + $0x280] ss:$8 sps:$4 sm:$0xff] (!%p2310_p4)  }
 0x178   : > { %1683 = vmatpush1.bf16.msra.mxu1 (!%p2310_p4), %v2652_v22  ;;  %v2764_v22 = vld [vmem:[%s3566_s2 + $0x290] ss:$8 sps:$4 sm:$0xff] (!%p2310_p4)  }
 0x179   : > { %1684 = vmatprep.subr.bf16.mxu1 (!%p2310_p4), %v2653_v23  ;;  %v2769_v23 = vld [vmem:[%s3566_s2 + $0x2a4] ss:$8 sps:$4 sm:$0xff] (!%p2310_p4)  }
 0x17a   : > { %2313 = vmatmul.mubr.msk.f32.vlgmr.msra.gmra.mrb[0].mxu0 (!%p2310_p4), %vm1198_vm2, %v1181_v21  ;;  %v2706_v21 = vld [vmem:[%s3566_s2 + $0x154] ss:$8 sps:$4 sm:$0xff] (!%p2310_p4)  }
 0x17c   : > { %1685 = vmatpush1.bf16.msra.mxu1 (!%p2310_p4), %v2655_v24  ;;  %v2704_v24 = vld [vmem:[%s3566_s2 + $0x150] ss:$8 sps:$4 sm:$0xff] (!%p2310_p4)  }
 0x17d   : > { %1686 = vmatprep.subr.bf16.mxu1 (!%p2310_p4), %v2656_v28  ;;  %v2709_v28 = vld [vmem:[%s3566_s2 + $0x164] ss:$8 sps:$4 sm:$0xff] (!%p2310_p4)  }
 0x180   : > { %1687 = vmatpush1.bf16.msra.mxu1 (!%p2310_p4), %v2658_v29  ;;  %v2767_v29 = vld [vmem:[%s3566_s2 + $0x2a0] ss:$8 sps:$4 sm:$0xff] (!%p2310_p4)  }
 0x181   : > { %1688 = vmatprep.subr.bf16.mxu1 (!%p2310_p4), %v2659_v31  ;;  %v2772_v31 = vld [vmem:[%s3566_s2 + $0x2b4] ss:$8 sps:$4 sm:$0xff] (!%p2310_p4)  }
 0x184   : > { %1689 = vmatpush1.bf16.msra.mxu1 (!%p2310_p4), %v2661_v38  ;;  %v2770_v38 = vld [vmem:[%s3566_s2 + $0x2b0] ss:$8 sps:$4 sm:$0xff] (!%p2310_p4)  }
 0x185   : > { %1690 = vmatprep.subr.bf16.mxu1 (!%p2310_p4), %v2662_v39  ;;  %v2775_v39 = vld [vmem:[%s3566_s2 + $0x2c4] ss:$8 sps:$4 sm:$0xff] (!%p2310_p4)  }
 0x188   : > { %1691 = vmatpush1.bf16.msra.mxu1 (!%p2310_p4), %v2664_v32  ;;  %v2710_v32 = vld [vmem:[%s3566_s2 + $0x170] ss:$8 sps:$4 sm:$0xff] (!%p2310_p4)  }
 0x189   : > { %1692 = vmatprep.subr.bf16.mxu1 (!%p2310_p4), %v2665_v40  ;;  %v2715_v40 = vld [vmem:[%s3566_s2 + $0x184] ss:$8 sps:$4 sm:$0xff] (!%p2310_p4)  }
 0x18c   : > { %1693 = vmatpush1.bf16.msra.mxu1 (!%p2310_p4), %v2667_v33  ;;  %v2773_v33 = vld [vmem:[%s3566_s2 + $0x2c0] ss:$8 sps:$4 sm:$0xff] (!%p2310_p4)  }
 0x18d   : > { %1694 = vmatprep.subr.bf16.mxu1 (!%p2310_p4), %v2668_v41  ;;  %v2778_v41 = vld [vmem:[%s3566_s2 + $0x2d4] ss:$8 sps:$4 sm:$0xff] (!%p2310_p4)  }
 0x190   : > { %1695 = vmatpush1.bf16.msra.mxu1 (!%p2310_p4), %v2670_v34  ;;  %v2713_v34 = vld [vmem:[%s3566_s2 + $0x180] ss:$8 sps:$4 sm:$0xff] (!%p2310_p4)  }
 0x191   : > { %1696 = vmatprep.subr.bf16.mxu1 (!%p2310_p4), %v2671_v35  ;;  %v2718_v35 = vld [vmem:[%s3566_s2 + $0x194] ss:$8 sps:$4 sm:$0xff] (!%p2310_p4)  }
 0x194   : > { %1697 = vmatpush1.bf16.msra.mxu1 (!%p2310_p4), %v2673_v42  ;;  %v2776_v42 = vld [vmem:[%s3566_s2 + $0x2d0] ss:$8 sps:$4 sm:$0xff] (!%p2310_p4)  }
 0x23d   : > { %v1051_v43 = vpop.f32.mrb[64].mxu0  ;;  %v1122_v44 = vpop.f32.mrb[64].mxu1 }
 0x23e   : > { %v1053_v46 = vpop.f32.mrb[65].mxu0  ;;  %v1124_v47 = vpop.f32.mrb[65].mxu1 }
 0x23f   : > { %v1131_v48 = vcombine.low %v1051_v43, %v1053_v46  ;;  %v1132_v49 = vcombine.low %v1122_v44, %v1124_v47  ;;  %v2674_v43 = vld [vmem:[%s3566_s2 + $0xb4] ss:$8 sps:$4 sm:$0xff] (!%p2310_p4)   ;;  %v2676_v44 = vld [vmem:[%s3566_s2 + $0xb0] ss:$8 sps:$4 sm:$0xff] (!%p2310_p4)   ;;  %v2737_v46 = vld [vmem:[%s3566_s2 + $0x200] ss:$8 sps:$4 sm:$0xff] (!%p2310_p4)  }
 0x240   : > { %1698 = vmatprep.subr.bf16.mxu1 (!%p2310_p4), %v2674_v43  ;;  %v2739_v47 = vld [vmem:[%s3566_s2 + $0x204] ss:$8 sps:$4 sm:$0xff] (!%p2310_p4)  }
 0x241   : > { %v1139_v50 = vrot.slane %v1131_v48, %v1138_v45  ;;  %v1146_v51 = vrot.slane %v1132_v49, %v1138_v45  ;;  %1173 = sbr.rel (%p2310_p4) target bundleno = 1289 (0x509), region = 48  ;;  %1965 = vmatprep.subr.bf16.mxu0 (!%p2310_p4), %v2739_v47  ;;  %v2742_v48 = vld [vmem:[%s3566_s2 + $0x214] ss:$8 sps:$4 sm:$0xff] (!%p2310_p4)   ;;  %1699 = vmatpush1.bf16.msra.mxu1 (!%p2310_p4), %v2676_v44  ;;  %v2679_v49 = vld [vmem:[%s3566_s2 + $0xc0] ss:$8 sps:$4 sm:$0xff] (!%p2310_p4)  }
 0x242   : > { %1966 = vmatpush1.bf16.msra.mxu0 (!%p2310_p4), %v2737_v46  ;;  %v2781_v43 = vld [vmem:[%s3566_s2 + $0x2e4] ss:$8 sps:$4 sm:$0xff] (!%p2310_p4)   ;;  %v2716_v44 = vld [vmem:[%s3566_s2 + $0x190] ss:$8 sps:$4 sm:$0xff] (!%p2310_p4)   ;;  %v2779_v46 = vld [vmem:[%s3566_s2 + $0x2e0] ss:$8 sps:$4 sm:$0xff] (!%p2310_p4)  }
 0x243   : > { %v1147_v52 = vcombine.low %v1139_v50, %v1146_v51  ;;  %v2740_v50 = vld [vmem:[%s3566_s2 + $0x210] ss:$8 sps:$4 sm:$0xff] (!%p2310_p4)   ;;  %v2680_v51 = vld [vmem:[%s3566_s2 + $0xd4] ss:$8 sps:$4 sm:$0xff] (!%p2310_p4)   ;;  %1967 = vmatprep.subr.bf16.mxu0 (!%p2310_p4), %v2742_v48  ;;  %v2719_v48 = vld [vmem:[%s3566_s2 + $0x1a0] ss:$8 sps:$4 sm:$0xff] (!%p2310_p4)  }
 0x244   : > { %v2784_v47 = vld [vmem:[%s3566_s2 + $0x2f4] ss:$8 sps:$4 sm:$0xff] (!%p2310_p4)  }
 0x245   : > { %v1154_v60 = vrot.slane %v1147_v52, %v1138_v45  ;;  %v2677_v45 = vld [vmem:[%s3566_s2 + $0xc4] ss:$8 sps:$4 sm:$0xff] (!%p2310_p4)  }
 0x246   : > { %1700 = vmatprep.subr.bf16.mxu1 (!%p2310_p4), %v2677_v45  ;;  %v2745_v52 = vld [vmem:[%s3566_s2 + $0x224] ss:$8 sps:$4 sm:$0xff] (!%p2310_p4)   ;;  %1968 = vmatpush1.bf16.msra.mxu0 (!%p2310_p4), %v2740_v50  ;;  %v2782_v50 = vld [vmem:[%s3566_s2 + $0x2f0] ss:$8 sps:$4 sm:$0xff] (!%p2310_p4)  }
 0x247   : > { %1168 = vst.msk [vmem:[%s1167_s28] ss:$8 sm:$0xf] %vm1158_vm1, %v1154_v60  ;;  %1701 = vmatpush1.bf16.msra.mxu1 (!%p2310_p4), %v2679_v49  ;;  %v2682_v60 = vld [vmem:[%s3566_s2 + $0xd0] ss:$8 sps:$4 sm:$0xff] (!%p2310_p4)   ;;  %1969 = vmatprep.subr.bf16.mxu0 (!%p2310_p4), %v2745_v52 }
 0x248   : > { %1702 = vmatprep.subr.bf16.mxu1 %v2680_v51  ;;  %v2721_v45 = vld [vmem:[%s3566_s2 + $0x1a4] ss:$8 sps:$4 sm:$0xff]   ;;  %v2724_v49 = vld [vmem:[%s3566_s2 + $0x1b4] ss:$8 sps:$4 sm:$0xff]   ;;  %v2722_v51 = vld [vmem:[%s3566_s2 + $0x1b0] ss:$8 sps:$4 sm:$0xff]  }
 0x249   : > { %v2727_v52 = vld [vmem:[%s3566_s2 + $0x1c4] ss:$8 sps:$4 sm:$0xff]  }
 0x24a   : > { %1970 = vmatpush1.bf16.msra.mxu0 %v2743_v53  ;;  %v2730_v53 = vld [vmem:[%s3566_s2 + $0x1d4] ss:$8 sps:$4 sm:$0xff]  }
 0x24b   : > { %1703 = vmatpush1.bf16.msra.mxu1 %v2682_v60  ;;  %1971 = vmatprep.subr.bf16.mxu0 %v2748_v55  ;;  %v2725_v60 = vld [vmem:[%s3566_s2 + $0x1c0] ss:$8 sps:$4 sm:$0xff]   ;;  %v2733_v55 = vld [vmem:[%s3566_s2 + $0x1e4] ss:$8 sps:$4 sm:$0xff]  }
 0x24c   : > { %1704 = vmatprep.subr.bf16.mxu1 %v2683_v54  ;;  %v2728_v54 = vld [vmem:[%s3566_s2 + $0x1d0] ss:$8 sps:$4 sm:$0xff]  }
 0x24e   : > { %v1274_v36 = vld [vmem:[#allocation2 + $0x8] sm:$0xff]  ;;  %v1273_v62 = vld [vmem:[#allocation2] sm:$0xff]  ;;  %1972 = vmatpush1.bf16.msra.mxu0 %v2746_v25  ;;  %v1276_v0 = vld [vmem:[#allocation2 + $0x18] sm:$0xff] }
 0x24f   : > { %v1278_v37 = vpack.c.bf16 %v1274_v36, %v1274_v36  ;;  %1705 = vmatpush1.bf16.msra.mxu1 %v2685_v56  ;;  %1973 = vmatprep.subr.bf16.mxu0 %v2751_v58  ;;  %v1277_v3 = vpack.c.bf16 %v1273_v62, %v1273_v62  ;;  %v1280_v5 = vpack.c.bf16 %v1276_v0, %v1276_v0  ;;  %v2707_v36 = vld [vmem:[%s3566_s2 + $0x160] ss:$8 sps:$4 sm:$0xff]   ;;  %v2736_v25 = vld [vmem:[%s3566_s2 + $0x1f4] ss:$8 sps:$4 sm:$0xff]   ;;  %v1268_v62 = vpop.f32.mrb[0].mxu0 }
 0x250   : > { %1706 = vmatprep.subr.bf16.mxu1 %v2686_v57  ;;  %v2731_v56 = vld [vmem:[%s3566_s2 + $0x1e0] ss:$8 sps:$4 sm:$0xff]   ;;  %v2734_v57 = vld [vmem:[%s3566_s2 + $0x1f0] ss:$8 sps:$4 sm:$0xff]  }
 0x251   : > { %1708 = vmatprep.mubr.bf16.mxu1 %v1278_v37  ;;  %v2712_v37 = vld [vmem:[%s3566_s2 + $0x174] ss:$8 sps:$4 sm:$0xff]  }
 0x252   : > { %1974 = vmatpush1.bf16.msra.mxu0 %v2749_v63  ;;  %v1275_v58 = vld [vmem:[#allocation2 + $0x10] sm:$0xff]  ;;  %v1270_v63 = vpop.f32.mrb[1].mxu0 }
 0x253   : > { %1707 = vmatpush1.bf16.msra.mxu1 %v2688_v59  ;;  %1975 = vmatprep.subr.bf16.mxu0 %v2754_v1  ;;  %v1279_v59 = vpack.c.bf16 %v1275_v58, %v1275_v58  ;;  %v1761_v0 = vpack.c.bf16 %v1270_v63, %v1270_v63  ;;  %v2786_v1 = vld [vmem:[%s3567_s3] sm:$0xff]  }
 0x254   : > { %1717 = vmatprep.subr.bf16.mxu1 %v2691_v61  ;;  %v2785_v61 = vld [vmem:[%s3567_s3 + $0x40] sm:$0xff]  }
 0x255   : > { %1997 = vmatprep.mubr.bf16.mxu0 %v1761_v0 }
 0x256   : > { %1709 = vmatmul.mubr.bf16.vlgmr.msra.gmra.mrb[0].mxu1 %v1277_v3  ;;  %1976 = vmatpush1.bf16.msra.mxu0 %v2752_v6  ;;  %v2787_v3 = vld [vmem:[%s3567_s3 + $0x48] sm:$0xff]   ;;  %v2790_v6 = vld [vmem:[%s3567_s3 + $0x10] sm:$0xff]  }
 0x257   : > { %1718 = vmatpush1.bf16.msra.mxu1 %v2689_v2  ;;  %1749 = vmatprep.mubr.bf16.mxu1 %v1280_v5  ;;  %v1760_v2 = vpack.c.bf16 %v1268_v62, %v1268_v62  ;;  %v2789_v5 = vld [vmem:[%s3567_s3 + $0x50] sm:$0xff]  }
 0x258   : > { %1719 = vmatprep.subr.bf16.mxu1 %v2694_v4  ;;  %1977 = vmatprep.subr.bf16.mxu0 %v2757_v7  ;;  %v2788_v4 = vld [vmem:[%s3567_s3 + $0x8] sm:$0xff]   ;;  %v2791_v7 = vld [vmem:[%s3567_s3 + $0x58] sm:$0xff]  }
 0x25a   : > { %1978 = vmatpush1.bf16.msra.mxu0 %v2755_v10  ;;  %v2794_v10 = vld [vmem:[%s3567_s3 + $0x20] sm:$0xff]  }
 0x25b   : > { %1720 = vmatpush1.bf16.msra.mxu1 %v2692_v8  ;;  %1979 = vmatprep.subr.bf16.mxu0 %v2760_v11  ;;  %v2792_v8 = vld [vmem:[%s3567_s3 + $0x18] sm:$0xff]   ;;  %v2795_v11 = vld [vmem:[%s3567_s3 + $0x68] sm:$0xff]  }
 0x25c   : > { %1721 = vmatprep.subr.bf16.mxu1 %v2697_v9  ;;  %v2793_v9 = vld [vmem:[%s3567_s3 + $0x60] sm:$0xff]  }
 0x25e   : > { %1980 = vmatpush1.bf16.msra.mxu0 %v2758_v14  ;;  %v2798_v14 = vld [vmem:[%s3567_s3 + $0x30] sm:$0xff]  }
 0x25f   : > { %1722 = vmatpush1.bf16.msra.mxu1 %v2695_v12  ;;  %1981 = vmatprep.subr.bf16.mxu0 %v2763_v15  ;;  %v2796_v12 = vld [vmem:[%s3567_s3 + $0x28] sm:$0xff]   ;;  %v2799_v15 = vld [vmem:[%s3567_s3 + $0x78] sm:$0xff]  }
 0x260   : > { %1723 = vmatprep.subr.bf16.mxu1 %v2700_v13  ;;  %v2797_v13 = vld [vmem:[%s3567_s3 + $0x70] sm:$0xff]  }
 0x262   : > { %1982 = vmatpush1.bf16.msra.mxu0 %v2761_v18 }
 0x263   : > { %1724 = vmatpush1.bf16.msra.mxu1 %v2698_v16  ;;  %1983 = vmatprep.subr.bf16.mxu0 %v2766_v19  ;;  %v2800_v16 = vld [vmem:[%s3567_s3 + $0x38] sm:$0xff]  }
 0x264   : > { %1725 = vmatprep.subr.bf16.mxu1 %v2703_v17 }
 0x266   : > { %1984 = vmatpush1.bf16.msra.mxu0 %v2764_v22 }
 0x267   : > { %1726 = vmatpush1.bf16.msra.mxu1 %v2701_v20  ;;  %1985 = vmatprep.subr.bf16.mxu0 %v2769_v23 }
 0x268   : > { %1727 = vmatprep.subr.bf16.mxu1 %v2706_v21  ;;  %v2311_v21 = vld [vmem:[%s3569_s5 + $0x1] ss:$8 sm:$0x3] }
 0x269   : > { %v1349_v22 = vrot.slane %v2311_v21, %v2988_v27  ;;  %v1353_v23 = vrot.slane %v2311_v21, %v2995_v30 }
 0x26a   : > { %1986 = vmatpush1.bf16.msra.mxu0 %v2767_v29 }
 0x26b   : > { %1728 = vmatpush1.bf16.msra.mxu1 %v2704_v24  ;;  %1987 = vmatprep.subr.bf16.mxu0 %v2772_v31  ;;  %v2312_v24 = vld [vmem:[%s3569_s5 + $0x2] ss:$8 sm:$0x3] }
 0x26c   : > { %1729 = vmatprep.subr.bf16.mxu1 %v2709_v28  ;;  %v1798_v29 = vrot.slane %v2312_v24, %v2988_v27  ;;  %v2181_v27 = vsub.s32 4, %v2985_v26 }
 0x26e   : > { %1988 = vmatpush1.bf16.msra.mxu0 %v2770_v38 }
 0x26f   : > { %1730 = vmatpush1.bf16.msra.mxu1 %v2707_v36  ;;  %1989 = vmatprep.subr.bf16.mxu0 %v2775_v39  ;;  %v1802_v36 = vrot.slane %v2312_v24, %v2995_v30  ;;  %v1179_v30 = vld [vmem:[%s3569_s5] sm:$0x30] }
 0x270   : > { %1731 = vmatprep.subr.bf16.mxu1 %v2712_v37 }
 0x272   : > { %1990 = vmatpush1.bf16.msra.mxu0 %v2773_v33 }
 0x273   : > { %1732 = vmatpush1.bf16.msra.mxu1 %v2710_v32  ;;  %1991 = vmatprep.subr.bf16.mxu0 %v2778_v41 }
 0x274   : > { %1733 = vmatprep.subr.bf16.mxu1 %v2715_v40 }
 0x276   : > { %1992 = vmatpush1.bf16.msra.mxu0 %v2776_v42 }
 0x277   : > { %1734 = vmatpush1.bf16.msra.mxu1 %v2713_v34  ;;  %1993 = vmatprep.subr.bf16.mxu0 %v2781_v43 }
 0x278   : > { %1735 = vmatprep.subr.bf16.mxu1 %v2718_v35 }
 0x27a   : > { %1994 = vmatpush1.bf16.msra.mxu0 %v2779_v46  ;;  %v2189_v46 = vsub.s32 6, %v2985_v26 }
 0x27b   : > { %1736 = vmatpush1.bf16.msra.mxu1 %v2716_v44  ;;  %1995 = vmatprep.subr.bf16.mxu0 %v2784_v47  ;;  %v2185_v47 = vsub.s32 5, %v2985_v26 }
 0x27c   : > { %1737 = vmatprep.subr.bf16.mxu1 %v2721_v45 }
 0x27e   : > { %1996 = vmatpush1.bf16.msra.mxu0 %v2782_v50 }
 0x27f   : > { %1738 = vmatpush1.bf16.msra.mxu1 %v2719_v48  ;;  %2429 = vmatprep.subr.bf16.mxu0 %v2785_v61  ;;  %v1178_v48 = vld [vmem:[%s3569_s5 + $0x3] ss:$0 sm:$0xff] }
 0x280   : > { %1739 = vmatprep.subr.bf16.mxu1 %v2724_v49  ;;  %v1180_v49 = vld [vmem:[%s3569_s5] sm:$0xc0] }
 0x281   : > { %1998 = vmatmul.mubr.bf16.vlgmr.msra.gmra.mrb[4].mxu0 %v1760_v2 }
 0x282   : > { %2430 = vmatpush3.bf16.msra.mxu0 %v2786_v1 }
 0x283   : > { %1740 = vmatpush1.bf16.msra.mxu1 %v2722_v51  ;;  %2431 = vmatprep.subr.bf16.mxu0 %v2787_v3 }
 0x284   : > { %1741 = vmatprep.subr.bf16.mxu1 %v2727_v52  ;;  %v2182_v52 = vrot.slane %v1179_v30, %v2181_v27 }
 0x286   : > { %2432 = vmatpush3.bf16.msra.mxu0 %v2788_v4 }
 0x287   : > { %1742 = vmatpush1.bf16.msra.mxu1 %v2725_v60  ;;  %2433 = vmatprep.subr.bf16.mxu0 %v2789_v5 }
 0x288   : > { %1743 = vmatprep.subr.bf16.mxu1 %v2730_v53  ;;  %v2193_v53 = vsub.s32 7, %v2985_v26 }
 0x28a   : > { %2434 = vmatpush3.bf16.msra.mxu0 %v2790_v6  ;;  %v2194_v61 = vrot.slane %v1180_v49, %v2193_v53 }
 0x28b   : > { %1744 = vmatpush1.bf16.msra.mxu1 %v2728_v54  ;;  %2435 = vmatprep.subr.bf16.mxu0 %v2791_v7 }
 0x28c   : > { %1745 = vmatprep.subr.bf16.mxu1 %v2733_v55 }
 0x28e   : > { %2436 = vmatpush3.bf16.msra.mxu0 %v2792_v8 }
 0x28f   : > { %1746 = vmatpush1.bf16.msra.mxu1 %v2731_v56  ;;  %2437 = vmatprep.subr.bf16.mxu0 %v2793_v9  ;;  %v2190_v56 = vrot.slane %v1180_v49, %v2189_v46 }
 0x290   : > { %1747 = vmatprep.subr.bf16.mxu1 %v2736_v25 }
 0x292   : > { %2438 = vmatpush3.bf16.msra.mxu0 %v2794_v10 }
 0x293   : > { %1748 = vmatpush1.bf16.msra.mxu1 %v2734_v57  ;;  %2439 = vmatprep.subr.bf16.mxu0 %v2795_v11  ;;  %v2186_v57 = vrot.slane %v1179_v30, %v2185_v47 }
 0x296   : > { %1750 = vmatmul.mubr.bf16.vlgmr.msra.gmra.mrb[0].mxu1 %v1279_v59  ;;  %2440 = vmatpush3.bf16.msra.mxu0 %v2796_v12 }
 0x297   : > { %2441 = vmatprep.subr.bf16.mxu0 %v2797_v13 }
 0x29a   : > { %2442 = vmatpush3.bf16.msra.mxu0 %v2798_v14 }
 0x29b   : > { %2443 = vmatprep.subr.bf16.mxu0 %v2799_v15 }
 0x29e   : > { %2444 = vmatpush3.bf16.msra.mxu0 %v2800_v16 }
 0x354   : > { %v1999_v37 = vpop.f32.mrb[4].mxu0 }
 0x355   : > { %v2000_v38 = vadd.f32 %v1999_v37, %v1798_v29  ;;  %v2001_v39 = vpop.f32.mrb[5].mxu0 }
 0x356   : > { %v2002_v32 = vadd.f32 %v2001_v39, %v1802_v36  ;;  %v2003_v40 = vpop.f32.mrb[6].mxu0 }
 0x357   : > { %v2004_v33 = vpop.f32.mrb[7].mxu0 }
 0x369   : > { %v1751_v17 = vpop.f32.mrb[0].mxu1 }
 0x36a   : > { %v1753_v18 = vpop.f32.mrb[1].mxu1  ;;  %v2595_v28 = vadd.f32 %v1751_v17, %v1349_v22 }
 0x36b   : > { %v1755_v19 = vpop.f32.mrb[2].mxu1  ;;  %v2596_v31 = vadd.f32 %v1753_v18, %v1353_v23 }
 0x36c   : > { %v1756_v20 = vpop.f32.mrb[3].mxu1  ;;  %2801 = vtanh.f32 %v2595_v28 }
 0x36d   : > { %2803 = vtanh.f32 %v2596_v31 }
 0x36e   : > { %2805 = vtanh.f32 %v2000_v38 }
 0x36f   : > { %2807 = vtanh.f32 %v2002_v32 }
 0x376   : > { %v2802_v41 = vpop.eup %2801 }
 0x377   : > { %v2804_v34 = vpop.eup %2803 }
 0x378   : > { %v2806_v35 = vpop.eup %2805 }
 0x379   : > { %v2808_v42 = vpop.eup %2807  ;;  %v2008_v43 = vpack.c.bf16 %v2806_v35, %v2802_v41 }
 0x37a   : > { %v2009_v44 = vpack.c.bf16 %v2808_v42, %v2804_v34 }
 0x37c   : > { %2170 = vmatprep.mubr.bf16.mxu0 %v2009_v44 }
 0x37d   : > { %2171 = vmatmul.mubr.bf16.vlgmr.msra.gmra.mrb[8].mxu0 %v2008_v43 }
 0x450   : > { %v2445_v45 = vpop.f32.mrb[8].mxu0 }
 0x451   : > { %v2446_v50 = vpop.f32.mrb[9].mxu0 }
 0x452   : > { %v2447_v51 = vadd.f32 %v2446_v50, %v2445_v45  ;;  %v2448_v60 = vpop.f32.mrb[10].mxu0 }
 0x453   : > { %v2449_v54 = vpop.f32.mrb[11].mxu0 }
 0x454   : > { %v2173_v55 = vadd.f32 %v2447_v51, %v1178_v48  ;;  %v2450_v25 = vadd.f32 %v2449_v54, %v2448_v60 }
 0x456   : > { %v2195_v58 = vmul.f32 %v2182_v52, %v2173_v55  ;;  %v2176_v59 = vadd.f32 %v2450_v25, %v1178_v48 }
 0x458   : > { %v2197_v62 = vadd.f32 %v2195_v58, %v2190_v56  ;;  %v2196_v63 = vmul.f32 %v2186_v57, %v2176_v59 }
 0x45a   : > { %2809 = vtanh.f32 %v2197_v62  ;;  %v2198_v0 = vadd.f32 %v2196_v63, %v2194_v61 }
 0x45c   : > { %2811 = vtanh.f32 %v2198_v0 }
 0x464   : > { %v2810_v1 = vpop.eup %2809 }
 0x465   : > { %v2201_v2 = vmul.f32 %v2810_v1, %v2810_v1 }
 0x466   : > { %v2812_v3 = vpop.eup %2811 }
 0x467   : > { %2203 = vadd.xlane.f32.xlu0 %v2201_v2  ;;  %v2202_v4 = vmul.f32 %v2812_v3, %v2812_v3 }
 0x46b   : > { %2205 = vadd.xlane.f32.xlu0 %v2202_v4 }
 0x4f4   : > { %v2204_v26 = vpop.xlane.xlu0 %2203 }
 0x4f5   : > { %v2207_v5 = vmax.f32 %v2204_v26, 1e-24 }
 0x4f7   : > { %2813 = vrsqrt.f32 %v2207_v5 }
 0x4f8   : > { %v2206_v6 = vpop.xlane.xlu0 %2205 }
 0x4f9   : > { %v2208_v7 = vmax.f32 %v2206_v6, 1e-24 }
 0x4fb   : > { %2815 = vrsqrt.f32 %v2208_v7 }
 0x501   : > { %v2814_v8 = vpop.eup %2813 }
 0x502   : > { %v2211_v9 = vmul.f32 %v2814_v8, %v2810_v1 }
 0x504   : > { %2213 = vst [vmem:[%s3570_s6] sm:$0xff] %v2211_v9 }
 0x505   : > { %v2816_v10 = vpop.eup %2815 }
 0x506   : > { %v2212_v11 = vmul.f32 %v2816_v10, %v2812_v3 }
 0x508   : > { %2214 = vst [vmem:[%s3570_s6 + $0x8] sm:$0xff] %v2212_v11 }
 0x509 PF: > { %s16_s21 = sadd.s32 1, %s2823_s21  }
 0x50a   : > { %p13_p5 = scmp.ge.s32.totalorder %s16_s21, 10  }
 0x50c   :  { %15 = sbr.rel (!%p13_p5) target bundleno = 1 (0x1), region = 77 }

</bundles_post_ra>
